<compile_context>
chip_gen: v7x
topology: tpu7x:2x2x1
jax: 0.10.0
libtpu: 0.0.40
codegen_flags: <defaults>
</compile_context>

<pallas_src>
import functools

import jax
import jax.numpy as jnp
from jax import lax
from jax.experimental import pallas as pl
from jax.experimental.pallas import tpu as pltpu


# ----------------------------- in-kernel helpers ----------------------------

def _layernorm_f32(x, g, b, eps):
    """LayerNorm over the last dim; x (R, N) f32, g/b (1, N) f32."""
    mu = jnp.mean(x, axis=-1, keepdims=True)
    var = jnp.mean(jnp.square(x - mu), axis=-1, keepdims=True)
    return (x - mu) * lax.rsqrt(var + eps) * g + b


def _encoder_body(h_ref, ln1g_ref, ln1b_ref, wqkv_ref, bqkv_ref, wo_ref, ob_ref,
                  ln2g_ref, ln2b_ref, w1_ref, b1_ref, w2_ref, b2_ref,
                  *, num_heads, head_dim, eps):
    """One pre-LN CLIP encoder layer on a (S, hid) block; returns f32 (S, hid)."""
    hid = num_heads * head_dim
    x = h_ref[0].astype(jnp.float32)                              # (S, hid) residual, f32

    # --- attention: LN1 + fused QKV matmul (bf16 in, f32 acc) ---
    xn = _layernorm_f32(x, ln1g_ref[...].astype(jnp.float32),
                        ln1b_ref[...].astype(jnp.float32), eps)
    qkv = jnp.dot(xn.astype(jnp.bfloat16), wqkv_ref[...],
                  preferred_element_type=jnp.float32) + bqkv_ref[...]   # (S, 3*hid) f32

    # per-head attention; heads concatenated back into (S, hid) then ONE o-proj.
    # TODO(synk): roll this loop (lax.fori_loop / head grid axis) at production head counts.
    ctx_parts = []
    for hh in range(num_heads):
        lo = hh * head_dim
        hi = lo + head_dim
        qh = qkv[:, lo:hi].astype(jnp.bfloat16)                   # scale pre-folded into Wq/bq
        kh = qkv[:, hid + lo:hid + hi].astype(jnp.bfloat16)
        vh = qkv[:, 2 * hid + lo:2 * hid + hi].astype(jnp.bfloat16)
        # scores without materializing k^T: contract last dims of q and k
        s = lax.dot_general(qh, kh, (((1,), (1,)), ((), ())),
                            preferred_element_type=jnp.float32)   # (S, S) f32
        s = s - jnp.max(s, axis=-1, keepdims=True)
        p = jnp.exp(s)
        p = p * pl.reciprocal(jnp.sum(p, axis=-1, keepdims=True), approx=True)
        ctx_parts.append(jnp.dot(p.astype(jnp.bfloat16), vh,
                                 preferred_element_type=jnp.float32))   # (S, hd) f32
    ctx = jnp.concatenate(ctx_parts, axis=-1)                     # (S, hid) f32

    attn = jnp.dot(ctx.astype(jnp.bfloat16), wo_ref[...],
                   preferred_element_type=jnp.float32) + ob_ref[...]
    x = x + attn                                                  # residual add, f32

    # --- MLP: LN2 + fc1 + quick_gelu + fc2 + residual ---
    xn2 = _layernorm_f32(x, ln2g_ref[...].astype(jnp.float32),
                         ln2b_ref[...].astype(jnp.float32), eps)
    m = jnp.dot(xn2.astype(jnp.bfloat16), w1_ref[...],
                preferred_element_type=jnp.float32) + b1_ref[...]
    m = m * jax.nn.sigmoid(1.702 * m)                             # quick_gelu (EUP)
    y = jnp.dot(m.astype(jnp.bfloat16), w2_ref[...],
                preferred_element_type=jnp.float32) + b2_ref[...]
    return x + y                                                  # (S, hid) f32


# ----------------------------- fused Pallas kernels --------------------------

def _embed_kernel(patches_ref, pw_ref, cls_pos_ref, g_ref, b_ref, out_ref, *, eps):
    # patches: (1, S, K) with row 0 zeroed (CLS slot); pw: (K, hid) bf16;
    # cls_pos: (S, hid) f32 = position embedding with class embedding folded into row 0.
    p = patches_ref[0].astype(jnp.bfloat16)                       # (S, K)
    x = jnp.dot(p, pw_ref[...], preferred_element_type=jnp.float32)      # (S, hid) f32
    x = x + cls_pos_ref[...]
    out_ref[0] = _layernorm_f32(
        x, g_ref[...].astype(jnp.float32), b_ref[...].astype(jnp.float32), eps
    ).astype(out_ref.dtype)


def _layer_kernel(h_ref, ln1g_ref, ln1b_ref, wqkv_ref, bqkv_ref, wo_ref, ob_ref,
                  ln2g_ref, ln2b_ref, w1_ref, b1_ref, w2_ref, b2_ref,
                  out_ref, *, num_heads, head_dim, eps):
    out = _encoder_body(h_ref, ln1g_ref, ln1b_ref, wqkv_ref, bqkv_ref, wo_ref, ob_ref,
                        ln2g_ref, ln2b_ref, w1_ref, b1_ref, w2_ref, b2_ref,
                        num_heads=num_heads, head_dim=head_dim, eps=eps)
    out_ref[0] = out.astype(out_ref.dtype)


def _last_layer_kernel(h_ref, ln1g_ref, ln1b_ref, wqkv_ref, bqkv_ref, wo_ref, ob_ref,
                       ln2g_ref, ln2b_ref, w1_ref, b1_ref, w2_ref, b2_ref,
                       postg_ref, postb_ref, projw_ref,
                       emb_ref, *, num_heads, head_dim, eps):
    # Same encoder layer, plus the pooled-CLS post-LN + visual projection fused in
    # (no extra pallas_call, no (B, S, hid) HBM write for the final hidden state).
    out = _encoder_body(h_ref, ln1g_ref, ln1b_ref, wqkv_ref, bqkv_ref, wo_ref, ob_ref,
                        ln2g_ref, ln2b_ref, w1_ref, b1_ref, w2_ref, b2_ref,
                        num_heads=num_heads, head_dim=head_dim, eps=eps)
    cls = out[0:1, :]                                             # (1, hid) pooled CLS
    cn = _layernorm_f32(cls, postg_ref[...].astype(jnp.float32),
                        postb_ref[...].astype(jnp.float32), eps)
    emb_ref[0] = jnp.dot(cn.astype(jnp.bfloat16), projw_ref[...],
                         preferred_element_type=jnp.float32).astype(emb_ref.dtype)


# ----------------------------- pallas_call wrappers ---------------------------

def _const_spec(shape):
    # Weight block: full array, index_map constant across the batch grid axis.
    return pl.BlockSpec(shape, lambda bi, _s=shape: (0,) * len(_s))


def _layer_in_specs(S, hid, inter):
    return [
        pl.BlockSpec((1, S, hid), lambda bi: (bi, 0, 0)),   # h (residual stream)
        _const_spec((1, hid)), _const_spec((1, hid)),       # ln1 g/b
        _const_spec((hid, 3 * hid)), _const_spec((1, 3 * hid)),   # fused QKV w/b
        _const_spec((hid, hid)), _const_spec((1, hid)),     # o_w / o_b
        _const_spec((1, hid)), _const_spec((1, hid)),       # ln2 g/b
        _const_spec((hid, inter)), _const_spec((1, inter)), # fc1 w/b
        _const_spec((inter, hid)), _const_spec((1, hid)),   # fc2 w/b
    ]


def embed_prenorm(patches, patch_w, cls_pos, g, b, eps):
    B, S, K = patches.shape
    hid = patch_w.shape[1]
    return pl.pallas_call(
        functools.partial(_embed_kernel, eps=eps),
        out_shape=jax.ShapeDtypeStruct((B, S, hid), jnp.bfloat16),
        grid=(B,),
        in_specs=[
            pl.BlockSpec((1, S, K), lambda bi: (bi, 0, 0)),
            _const_spec((K, hid)),
            _const_spec((S, hid)),
            _const_spec((1, hid)),
            _const_spec((1, hid)),
        ],
        out_specs=pl.BlockSpec((1, S, hid), lambda bi: (bi, 0, 0)),
        compiler_params=pltpu.CompilerParams(dimension_semantics=("parallel",)),
    )(patches, patch_w, cls_pos, g, b)


def encoder_layer(h, lyr, num_heads, eps):
    B, S, hid = h.shape
    inter = lyr["fc1_w"].shape[1]
    hd = hid // num_heads
    return pl.pallas_call(
        functools.partial(_layer_kernel, num_heads=num_heads, head_dim=hd, eps=eps),
        out_shape=jax.ShapeDtypeStruct((B, S, hid), h.dtype),
        grid=(B,),
        in_specs=_layer_in_specs(S, hid, inter),
        out_specs=pl.BlockSpec((1, S, hid), lambda bi: (bi, 0, 0)),
        compiler_params=pltpu.CompilerParams(dimension_semantics=("parallel",)),
    )(h, lyr["ln1_g"], lyr["ln1_b"], lyr["w_qkv"], lyr["b_qkv"], lyr["o_w"], lyr["o_b"],
      lyr["ln2_g"], lyr["ln2_b"], lyr["fc1_w"], lyr["fc1_b"], lyr["fc2_w"], lyr["fc2_b"])


def encoder_layer_with_head(h, lyr, post_g, post_b, proj_w, num_heads, eps):
    B, S, hid = h.shape
    inter = lyr["fc1_w"].shape[1]
    proj = proj_w.shape[1]
    hd = hid // num_heads
    in_specs = _layer_in_specs(S, hid, inter) + [
        _const_spec((1, hid)), _const_spec((1, hid)),        # post-LN g/b
        _const_spec((hid, proj)),                            # visual projection (no bias)
    ]
    emb = pl.pallas_call(
        functools.partial(_last_layer_kernel, num_heads=num_heads, head_dim=hd, eps=eps),
        out_shape=jax.ShapeDtypeStruct((B, 1, proj), jnp.float32),
        grid=(B,),
        in_specs=in_specs,
        out_specs=pl.BlockSpec((1, 1, proj), lambda bi: (bi, 0, 0)),
        compiler_params=pltpu.CompilerParams(dimension_semantics=("parallel",)),
    )(h, lyr["ln1_g"], lyr["ln1_b"], lyr["w_qkv"], lyr["b_qkv"], lyr["o_w"], lyr["o_b"],
      lyr["ln2_g"], lyr["ln2_b"], lyr["fc1_w"], lyr["fc1_b"], lyr["fc2_w"], lyr["fc2_b"],
      post_g, post_b, proj_w)
    return emb.reshape(B, proj)


# ----------------------------- model config / params -------------------------

CFG = dict(
    image_size=16,
    patch_size=8,
    num_channels=3,
    hidden_size=32,
    num_heads=4,
    intermediate_size=64,
    num_layers=2,
    projection_dim=24,
    layer_norm_eps=1e-5,
)


def init_params(key, cfg):
    """Raw (HF-layout-like) f32 parameters."""
    c = cfg
    hid = c["hidden_size"]
    inter = c["intermediate_size"]
    ps = c["patch_size"]
    nc = c["num_channels"]
    num_patches = (c["image_size"] // ps) ** 2
    seq = num_patches + 1

    def nrm(k, shape, std=0.02):
        return (std * jax.random.normal(k, shape)).astype(jnp.float32)

    keys = iter(jax.random.split(key, 8 + 16 * c["num_layers"]))
    params = {
        # NOTE: real PyTorch Conv2d weight (hid, C, ps, ps) must be reshaped/transposed
        # to (C*ps*ps, hid) in exactly this (C, ps, ps) order when porting checkpoints.
        "patch_w": nrm(next(keys), (nc * ps * ps, hid)),
        "class_embedding": nrm(next(keys), (hid,)),
        "pos_embedding": nrm(next(keys), (seq, hid)),
        "pre_ln_g": jnp.ones((hid,), jnp.float32),
        "pre_ln_b": jnp.zeros((hid,), jnp.float32),
        "post_ln_g": jnp.ones((hid,), jnp.float32),
        "post_ln_b": jnp.zeros((hid,), jnp.float32),
        "visual_projection": nrm(next(keys), (hid, c["projection_dim"])),
        "layers": [],
    }
    for _ in range(c["num_layers"]):
        layer = {
            "ln1_g": jnp.ones((hid,), jnp.float32),
            "ln1_b": jnp.zeros((hid,), jnp.float32),
            "q_w": nrm(next(keys), (hid, hid)), "q_b": nrm(next(keys), (hid,)),
            "k_w": nrm(next(keys), (hid, hid)), "k_b": nrm(next(keys), (hid,)),
            "v_w": nrm(next(keys), (hid, hid)), "v_b": nrm(next(keys), (hid,)),
            "o_w": nrm(next(keys), (hid, hid)), "o_b": nrm(next(keys), (hid,)),
            "ln2_g": jnp.ones((hid,), jnp.float32),
            "ln2_b": jnp.zeros((hid,), jnp.float32),
            "fc1_w": nrm(next(keys), (hid, inter)), "fc1_b": nrm(next(keys), (inter,)),
            "fc2_w": nrm(next(keys), (inter, hid)), "fc2_b": nrm(next(keys), (hid,)),
        }
        params["layers"].append(layer)
    return params


def pack_params(params, cfg):
    """One-time weight repack: QKV fusion, attention-scale folding into Wq/bq,
    bf16 matmul weights, (1, N) f32 biases / LN params, cls/pos fold.
    Done once (outside the jitted forward) so no per-call XLA transpose/scale ops."""
    hid = cfg["hidden_size"]
    nheads = cfg["num_heads"]
    hd = hid // nheads
    scale = float(hd) ** -0.5
    bf = jnp.bfloat16
    f32 = jnp.float32

    packed = {
        "patch_w": params["patch_w"].astype(bf),
        "cls_pos": params["pos_embedding"].at[0].add(params["class_embedding"]).astype(f32),
        "pre_ln_g": params["pre_ln_g"].reshape(1, hid).astype(f32),
        "pre_ln_b": params["pre_ln_b"].reshape(1, hid).astype(f32),
        "post_ln_g": params["post_ln_g"].reshape(1, hid).astype(f32),
        "post_ln_b": params["post_ln_b"].reshape(1, hid).astype(f32),
        "visual_projection": params["visual_projection"].astype(bf),
        "layers": [],
    }
    for lyr in params["layers"]:
        w_qkv = jnp.concatenate(
            [lyr["q_w"] * scale, lyr["k_w"], lyr["v_w"]], axis=1).astype(bf)   # (hid, 3*hid)
        b_qkv = jnp.concatenate(
            [lyr["q_b"] * scale, lyr["k_b"], lyr["v_b"]]).reshape(1, 3 * hid).astype(f32)
        packed["layers"].append({
            "ln1_g": lyr["ln1_g"].reshape(1, hid).astype(f32),
            "ln1_b": lyr["ln1_b"].reshape(1, hid).astype(f32),
            "w_qkv": w_qkv, "b_qkv": b_qkv,
            "o_w": lyr["o_w"].astype(bf),
            "o_b": lyr["o_b"].reshape(1, hid).astype(f32),
            "ln2_g": lyr["ln2_g"].reshape(1, hid).astype(f32),
            "ln2_b": lyr["ln2_b"].reshape(1, hid).astype(f32),
            "fc1_w": lyr["fc1_w"].astype(bf),
            "fc1_b": lyr["fc1_b"].reshape(1, -1).astype(f32),
            "fc2_w": lyr["fc2_w"].astype(bf),
            "fc2_b": lyr["fc2_b"].reshape(1, hid).astype(f32),
        })
    return packed


# ----------------------------- forward pass -----------------------------------

def clip_vision_wrapper_forward(packed, image_proc, cfg=CFG):
    """image_proc: (B, C, H, W) float32 (NCHW). Returns image_embeds (B, projection_dim)."""
    c = cfg
    B, C, H, W = image_proc.shape
    ps = c["patch_size"]
    nheads = c["num_heads"]
    eps = c["layer_norm_eps"]
    gh, gw = H // ps, W // ps
    P = gh * gw

    # --- patch extraction: NCHW -> (B, P, C*ps*ps); stays in XLA ---
    # TODO(synk): fold this relayout into the embed kernel with an index_map over (gh, gw)
    # tiles to avoid the HBM round-trip for large images.
    x = image_proc.reshape(B, C, gh, ps, gw, ps).transpose(0, 2, 4, 1, 3, 5)
    patches = x.reshape(B, P, C * ps * ps)
    # zero row 0 so the single (S, K) @ (K, hid) matmul leaves the CLS slot empty
    patches = jnp.pad(patches, ((0, 0), (1, 0), (0, 0)))

    # --- fused: patch matmul + cls/pos add + pre-LN (bf16 residual handoff) ---
    h = embed_prenorm(patches, packed["patch_w"], packed["cls_pos"],
                      packed["pre_ln_g"], packed["pre_ln_b"], eps)

    # --- encoder layers: one fused kernel per layer; last layer also produces embeds ---
    n_layers = len(packed["layers"])
    emb = None
    for li, lyr in enumerate(packed["layers"]):
        if li == n_layers - 1:
            emb = encoder_layer_with_head(h, lyr, packed["post_ln_g"], packed["post_ln_b"],
                                          packed["visual_projection"], nheads, eps)
        else:
            h = encoder_layer(h, lyr, nheads, eps)
    return emb


# ----------------------------- main -------------------------------------------

if __name__ == "__main__":
    key = jax.random.PRNGKey(0)
    kp, kx = jax.random.split(key)
    params = init_params(kp, CFG)
    packed = pack_params(params, CFG)          # one-time weight repack (not per call)
    image_proc = jax.random.normal(
        kx, (2, CFG["num_channels"], CFG["image_size"], CFG["image_size"]),
        dtype=jnp.float32)

    fwd = jax.jit(clip_vision_wrapper_forward)
    out = fwd(packed, image_proc)
    out = jax.block_until_ready(out)
    assert out.shape == (2, CFG["projection_dim"]), out.shape
    assert bool(jnp.all(jnp.isfinite(out)))
    print("KERNEL_OK")
</pallas_src>

<mosaic_0001>
module attributes {stable_mosaic.version = 11 : i64} {
  func.func @_embed_kernel(%arg0: i32, %arg1: memref<1x5x192xf32, #tpu.memory_space<vmem>>, %arg2: memref<192x32xbf16, #tpu.memory_space<vmem>>, %arg3: memref<5x32xf32, #tpu.memory_space<vmem>>, %arg4: memref<1x32xf32, #tpu.memory_space<vmem>>, %arg5: memref<1x32xf32, #tpu.memory_space<vmem>>, %arg6: memref<1x5x32xbf16, #tpu.memory_space<vmem>>) attributes {dimension_semantics = [#tpu.dimension_semantics<parallel>], iteration_bounds = array<i64: 2>, scalar_prefetch = 0 : i64, scratch_operands = 0 : i64, tpu.core_type = #tpu.core_type<tc>, window_params = [{transform_indices = @transform_0, window_bounds = array<i64: 1, 5, 192>}, {pipeline_mode = #tpu.pipeline_mode<synchronous>, transform_indices = @transform_1, window_bounds = array<i64: 192, 32>}, {pipeline_mode = #tpu.pipeline_mode<synchronous>, transform_indices = @transform_2, window_bounds = array<i64: 5, 32>}, {pipeline_mode = #tpu.pipeline_mode<synchronous>, transform_indices = @transform_3, window_bounds = array<i64: 1, 32>}, {pipeline_mode = #tpu.pipeline_mode<synchronous>, transform_indices = @transform_4, window_bounds = array<i64: 1, 32>}, {transform_indices = @transform_5, window_bounds = array<i64: 1, 5, 32>}]} {
    %c0 = arith.constant 0 : index
    %c0_0 = arith.constant 0 : index
    %c0_1 = arith.constant 0 : index
    %0 = vector.load %arg1[%c0, %c0_0, %c0_1] : memref<1x5x192xf32, #tpu.memory_space<vmem>>, vector<1x5x192xf32>
    %1 = vector.shape_cast %0 : vector<1x5x192xf32> to vector<5x192xf32>
    %2 = arith.truncf %1 : vector<5x192xf32> to vector<5x192xbf16>
    %c0_2 = arith.constant 0 : index
    %c0_3 = arith.constant 0 : index
    %3 = vector.load %arg2[%c0_2, %c0_3] : memref<192x32xbf16, #tpu.memory_space<vmem>>, vector<192x32xbf16>
    %cst = arith.constant dense<0.000000e+00> : vector<5x32xf32>
    %4 = tpu.matmul %2, %3, %cst {dimension_numbers = #tpu.dot_dimension_numbers<[1], [0], [0], [1], [0, 0, 1, 1], [], []>} : vector<5x192xbf16>, vector<192x32xbf16>, vector<5x32xf32> -> vector<5x32xf32>
    %c0_4 = arith.constant 0 : index
    %c0_5 = arith.constant 0 : index
    %5 = vector.load %arg3[%c0_4, %c0_5] : memref<5x32xf32, #tpu.memory_space<vmem>>, vector<5x32xf32>
    %6 = arith.addf %4, %5 : vector<5x32xf32>
    %c0_6 = arith.constant 0 : index
    %c0_7 = arith.constant 0 : index
    %7 = vector.load %arg4[%c0_6, %c0_7] : memref<1x32xf32, #tpu.memory_space<vmem>>, vector<1x32xf32>
    %c0_8 = arith.constant 0 : index
    %c0_9 = arith.constant 0 : index
    %8 = vector.load %arg5[%c0_8, %c0_9] : memref<1x32xf32, #tpu.memory_space<vmem>>, vector<1x32xf32>
    %cst_10 = arith.constant dense<0.000000e+00> : vector<5xf32>
    %9 = vector.multi_reduction <add>, %6, %cst_10 [1] : vector<5x32xf32> to vector<5xf32>
    %10 = vector.shape_cast %9 : vector<5xf32> to vector<5x1xf32>
    %cst_11 = arith.constant 3.200000e+01 : f32
    %11 = vector.broadcast %cst_11 : f32 to vector<5x1xf32>
    %12 = arith.divf %10, %11 : vector<5x1xf32>
    %13 = vector.broadcast %12 : vector<5x1xf32> to vector<5x32xf32>
    %14 = arith.subf %6, %13 : vector<5x32xf32>
    %15 = arith.mulf %14, %14 : vector<5x32xf32>
    %cst_12 = arith.constant dense<0.000000e+00> : vector<5xf32>
    %16 = vector.multi_reduction <add>, %15, %cst_12 [1] : vector<5x32xf32> to vector<5xf32>
    %17 = vector.shape_cast %16 : vector<5xf32> to vector<5x1xf32>
    %cst_13 = arith.constant 3.200000e+01 : f32
    %18 = vector.broadcast %cst_13 : f32 to vector<5x1xf32>
    %19 = arith.divf %17, %18 : vector<5x1xf32>
    %20 = vector.broadcast %12 : vector<5x1xf32> to vector<5x32xf32>
    %21 = arith.subf %6, %20 : vector<5x32xf32>
    %cst_14 = arith.constant 9.99999974E-6 : f32
    %22 = vector.broadcast %cst_14 : f32 to vector<5x1xf32>
    %23 = arith.addf %19, %22 : vector<5x1xf32>
    %24 = math.rsqrt %23 : vector<5x1xf32>
    %25 = vector.broadcast %24 : vector<5x1xf32> to vector<5x32xf32>
    %26 = arith.mulf %21, %25 : vector<5x32xf32>
    %27 = vector.broadcast %7 : vector<1x32xf32> to vector<5x32xf32>
    %28 = arith.mulf %26, %27 : vector<5x32xf32>
    %29 = vector.broadcast %8 : vector<1x32xf32> to vector<5x32xf32>
    %30 = arith.addf %28, %29 : vector<5x32xf32>
    %31 = arith.truncf %30 : vector<5x32xf32> to vector<5x32xbf16>
    %c0_15 = arith.constant 0 : index
    %c0_16 = arith.constant 0 : index
    %c0_17 = arith.constant 0 : index
    %32 = vector.load %arg6[%c0_15, %c0_16, %c0_17] : memref<1x5x32xbf16, #tpu.memory_space<vmem>>, vector<1x5x32xbf16>
    %33 = vector.shape_cast %32 : vector<1x5x32xbf16> to vector<5x32xbf16>
    %34 = vector.shape_cast %31 : vector<5x32xbf16> to vector<1x5x32xbf16>
    tpu.vector_store %arg6[%c0_15, %c0_16, %c0_17], %34 {strides = array<i32>} : memref<1x5x32xbf16, #tpu.memory_space<vmem>>, vector<1x5x32xbf16>,
    return
  }
  func.func @transform_0(%arg0: i32) -> (i32, i32, i32) {
    %c0_i32 = arith.constant 0 : i32
    %c0_i32_0 = arith.constant 0 : i32
    %c0_i32_1 = arith.constant 0 : i32
    return %arg0, %c0_i32, %c0_i32_0 : i32, i32, i32
  }
  func.func @transform_1(%arg0: i32) -> (i32, i32) {
    %c0_i32 = arith.constant 0 : i32
    %c0_i32_0 = arith.constant 0 : i32
    %c0_i32_1 = arith.constant 0 : i32
    return %c0_i32, %c0_i32_0 : i32, i32
  }
  func.func @transform_2(%arg0: i32) -> (i32, i32) {
    %c0_i32 = arith.constant 0 : i32
    %c0_i32_0 = arith.constant 0 : i32
    %c0_i32_1 = arith.constant 0 : i32
    return %c0_i32, %c0_i32_0 : i32, i32
  }
  func.func @transform_3(%arg0: i32) -> (i32, i32) {
    %c0_i32 = arith.constant 0 : i32
    %c0_i32_0 = arith.constant 0 : i32
    %c0_i32_1 = arith.constant 0 : i32
    return %c0_i32, %c0_i32_0 : i32, i32
  }
  func.func @transform_4(%arg0: i32) -> (i32, i32) {
    %c0_i32 = arith.constant 0 : i32
    %c0_i32_0 = arith.constant 0 : i32
    %c0_i32_1 = arith.constant 0 : i32
    return %c0_i32, %c0_i32_0 : i32, i32
  }
  func.func @transform_5(%arg0: i32) -> (i32, i32, i32) {
    %c0_i32 = arith.constant 0 : i32
    %c0_i32_0 = arith.constant 0 : i32
    %c0_i32_1 = arith.constant 0 : i32
    return %arg0, %c0_i32, %c0_i32_0 : i32, i32, i32
  }
}

module attributes {stable_mosaic.version = 11 : i64} {
  func.func @_layer_kernel(%arg0: i32, %arg1: memref<1x5x32xbf16, #tpu.memory_space<vmem>>, %arg2: memref<1x32xf32, #tpu.memory_space<vmem>>, %arg3: memref<1x32xf32, #tpu.memory_space<vmem>>, %arg4: memref<32x96xbf16, #tpu.memory_space<vmem>>, %arg5: memref<1x96xf32, #tpu.memory_space<vmem>>, %arg6: memref<32x32xbf16, #tpu.memory_space<vmem>>, %arg7: memref<1x32xf32, #tpu.memory_space<vmem>>, %arg8: memref<1x32xf32, #tpu.memory_space<vmem>>, %arg9: memref<1x32xf32, #tpu.memory_space<vmem>>, %arg10: memref<32x64xbf16, #tpu.memory_space<vmem>>, %arg11: memref<1x64xf32, #tpu.memory_space<vmem>>, %arg12: memref<64x32xbf16, #tpu.memory_space<vmem>>, %arg13: memref<1x32xf32, #tpu.memory_space<vmem>>, %arg14: memref<1x5x32xbf16, #tpu.memory_space<vmem>>) attributes {dimension_semantics = [#tpu.dimension_semantics<parallel>], iteration_bounds = array<i64: 2>, scalar_prefetch = 0 : i64, scratch_operands = 0 : i64, tpu.core_type = #tpu.core_type<tc>, window_params = [{transform_indices = @transform_0, window_bounds = array<i64: 1, 5, 32>}, {pipeline_mode = #tpu.pipeline_mode<synchronous>, transform_indices = @transform_1, window_bounds = array<i64: 1, 32>}, {pipeline_mode = #tpu.pipeline_mode<synchronous>, transform_indices = @transform_2, window_bounds = array<i64: 1, 32>}, {pipeline_mode = #tpu.pipeline_mode<synchronous>, transform_indices = @transform_3, window_bounds = array<i64: 32, 96>}, {pipeline_mode = #tpu.pipeline_mode<synchronous>, transform_indices = @transform_4, window_bounds = array<i64: 1, 96>}, {pipeline_mode = #tpu.pipeline_mode<synchronous>, transform_indices = @transform_5, window_bounds = array<i64: 32, 32>}, {pipeline_mode = #tpu.pipeline_mode<synchronous>, transform_indices = @transform_6, window_bounds = array<i64: 1, 32>}, {pipeline_mode = #tpu.pipeline_mode<synchronous>, transform_indices = @transform_7, window_bounds = array<i64: 1, 32>}, {pipeline_mode = #tpu.pipeline_mode<synchronous>, transform_indices = @transform_8, window_bounds = array<i64: 1, 32>}, {pipeline_mode = #tpu.pipeline_mode<synchronous>, transform_indices = @transform_9, window_bounds = array<i64: 32, 64>}, {pipeline_mode = #tpu.pipeline_mode<synchronous>, transform_indices = @transform_10, window_bounds = array<i64: 1, 64>}, {pipeline_mode = #tpu.pipeline_mode<synchronous>, transform_indices = @transform_11, window_bounds = array<i64: 64, 32>}, {pipeline_mode = #tpu.pipeline_mode<synchronous>, transform_indices = @transform_12, window_bounds = array<i64: 1, 32>}, {transform_indices = @transform_13, window_bounds = array<i64: 1, 5, 32>}]} {
    %c0 = arith.constant 0 : index
    %c0_0 = arith.constant 0 : index
    %c0_1 = arith.constant 0 : index
    %0 = vector.load %arg1[%c0, %c0_0, %c0_1] : memref<1x5x32xbf16, #tpu.memory_space<vmem>>, vector<1x5x32xbf16>
    %1 = vector.shape_cast %0 : vector<1x5x32xbf16> to vector<5x32xbf16>
    %2 = arith.extf %1 : vector<5x32xbf16> to vector<5x32xf32>
    %c0_2 = arith.constant 0 : index
    %c0_3 = arith.constant 0 : index
    %3 = vector.load %arg2[%c0_2, %c0_3] : memref<1x32xf32, #tpu.memory_space<vmem>>, vector<1x32xf32>
    %c0_4 = arith.constant 0 : index
    %c0_5 = arith.constant 0 : index
    %4 = vector.load %arg3[%c0_4, %c0_5] : memref<1x32xf32, #tpu.memory_space<vmem>>, vector<1x32xf32>
    %cst = arith.constant dense<0.000000e+00> : vector<5xf32>
    %5 = vector.multi_reduction <add>, %2, %cst [1] : vector<5x32xf32> to vector<5xf32>
    %6 = vector.shape_cast %5 : vector<5xf32> to vector<5x1xf32>
    %cst_6 = arith.constant 3.200000e+01 : f32
    %7 = vector.broadcast %cst_6 : f32 to vector<5x1xf32>
    %8 = arith.divf %6, %7 : vector<5x1xf32>
    %9 = vector.broadcast %8 : vector<5x1xf32> to vector<5x32xf32>
    %10 = arith.subf %2, %9 : vector<5x32xf32>
    %11 = arith.mulf %10, %10 : vector<5x32xf32>
    %cst_7 = arith.constant dense<0.000000e+00> : vector<5xf32>
    %12 = vector.multi_reduction <add>, %11, %cst_7 [1] : vector<5x32xf32> to vector<5xf32>
    %13 = vector.shape_cast %12 : vector<5xf32> to vector<5x1xf32>
    %cst_8 = arith.constant 3.200000e+01 : f32
    %14 = vector.broadcast %cst_8 : f32 to vector<5x1xf32>
    %15 = arith.divf %13, %14 : vector<5x1xf32>
    %16 = vector.broadcast %8 : vector<5x1xf32> to vector<5x32xf32>
    %17 = arith.subf %2, %16 : vector<5x32xf32>
    %cst_9 = arith.constant 9.99999974E-6 : f32
    %18 = vector.broadcast %cst_9 : f32 to vector<5x1xf32>
    %19 = arith.addf %15, %18 : vector<5x1xf32>
    %20 = math.rsqrt %19 : vector<5x1xf32>
    %21 = vector.broadcast %20 : vector<5x1xf32> to vector<5x32xf32>
    %22 = arith.mulf %17, %21 : vector<5x32xf32>
    %23 = vector.broadcast %3 : vector<1x32xf32> to vector<5x32xf32>
    %24 = arith.mulf %22, %23 : vector<5x32xf32>
    %25 = vector.broadcast %4 : vector<1x32xf32> to vector<5x32xf32>
    %26 = arith.addf %24, %25 : vector<5x32xf32>
    %27 = arith.truncf %26 : vector<5x32xf32> to vector<5x32xbf16>
    %c0_10 = arith.constant 0 : index
    %c0_11 = arith.constant 0 : index
    %28 = vector.load %arg4[%c0_10, %c0_11] : memref<32x96xbf16, #tpu.memory_space<vmem>>, vector<32x96xbf16>
    %cst_12 = arith.constant dense<0.000000e+00> : vector<5x96xf32>
    %29 = tpu.matmul %27, %28, %cst_12 {dimension_numbers = #tpu.dot_dimension_numbers<[1], [0], [0], [1], [0, 0, 1, 1], [], []>} : vector<5x32xbf16>, vector<32x96xbf16>, vector<5x96xf32> -> vector<5x96xf32>
    %c0_13 = arith.constant 0 : index
    %c0_14 = arith.constant 0 : index
    %30 = vector.load %arg5[%c0_13, %c0_14] : memref<1x96xf32, #tpu.memory_space<vmem>>, vector<1x96xf32>
    %31 = vector.broadcast %30 : vector<1x96xf32> to vector<5x96xf32>
    %32 = arith.addf %29, %31 : vector<5x96xf32>
    %33 = vector.extract_strided_slice %32 {offsets = [0, 0], sizes = [5, 8], strides = [1, 1]} : vector<5x96xf32> to vector<5x8xf32>
    %34 = arith.truncf %33 : vector<5x8xf32> to vector<5x8xbf16>
    %35 = vector.extract_strided_slice %32 {offsets = [0, 32], sizes = [5, 8], strides = [1, 1]} : vector<5x96xf32> to vector<5x8xf32>
    %36 = arith.truncf %35 : vector<5x8xf32> to vector<5x8xbf16>
    %37 = vector.extract_strided_slice %32 {offsets = [0, 64], sizes = [5, 8], strides = [1, 1]} : vector<5x96xf32> to vector<5x8xf32>
    %38 = arith.truncf %37 : vector<5x8xf32> to vector<5x8xbf16>
    %cst_15 = arith.constant dense<0.000000e+00> : vector<5x5xf32>
    %39 = tpu.matmul %34, %36, %cst_15 {dimension_numbers = #tpu.dot_dimension_numbers<[1], [1], [0], [0], [0, 0, 1, 0], [], []>} : vector<5x8xbf16>, vector<5x8xbf16>, vector<5x5xf32> -> vector<5x5xf32>
    %cst_16 = arith.constant dense<0xFF800000> : vector<5xf32>
    %40 = vector.multi_reduction <maximumf>, %39, %cst_16 [1] : vector<5x5xf32> to vector<5xf32>
    %41 = vector.shape_cast %40 : vector<5xf32> to vector<5x1xf32>
    %42 = vector.broadcast %41 : vector<5x1xf32> to vector<5x5xf32>
    %43 = arith.subf %39, %42 : vector<5x5xf32>
    %44 = math.exp %43 : vector<5x5xf32>
    %cst_17 = arith.constant dense<0.000000e+00> : vector<5xf32>
    %45 = vector.multi_reduction <add>, %44, %cst_17 [1] : vector<5x5xf32> to vector<5xf32>
    %46 = vector.shape_cast %45 : vector<5xf32> to vector<5x1xf32>
    %47 = tpu.reciprocal %46 {approx = true} : vector<5x1xf32> -> vector<5x1xf32>
    %48 = vector.broadcast %47 : vector<5x1xf32> to vector<5x5xf32>
    %49 = arith.mulf %44, %48 : vector<5x5xf32>
    %50 = arith.truncf %49 : vector<5x5xf32> to vector<5x5xbf16>
    %cst_18 = arith.constant dense<0.000000e+00> : vector<5x8xf32>
    %51 = tpu.matmul %50, %38, %cst_18 {dimension_numbers = #tpu.dot_dimension_numbers<[1], [0], [0], [1], [0, 0, 1, 1], [], []>} : vector<5x5xbf16>, vector<5x8xbf16>, vector<5x8xf32> -> vector<5x8xf32>
    %52 = vector.extract_strided_slice %32 {offsets = [0, 8], sizes = [5, 8], strides = [1, 1]} : vector<5x96xf32> to vector<5x8xf32>
    %53 = arith.truncf %52 : vector<5x8xf32> to vector<5x8xbf16>
    %54 = vector.extract_strided_slice %32 {offsets = [0, 40], sizes = [5, 8], strides = [1, 1]} : vector<5x96xf32> to vector<5x8xf32>
    %55 = arith.truncf %54 : vector<5x8xf32> to vector<5x8xbf16>
    %56 = vector.extract_strided_slice %32 {offsets = [0, 72], sizes = [5, 8], strides = [1, 1]} : vector<5x96xf32> to vector<5x8xf32>
    %57 = arith.truncf %56 : vector<5x8xf32> to vector<5x8xbf16>
    %cst_19 = arith.constant dense<0.000000e+00> : vector<5x5xf32>
    %58 = tpu.matmul %53, %55, %cst_19 {dimension_numbers = #tpu.dot_dimension_numbers<[1], [1], [0], [0], [0, 0, 1, 0], [], []>} : vector<5x8xbf16>, vector<5x8xbf16>, vector<5x5xf32> -> vector<5x5xf32>
    %cst_20 = arith.constant dense<0xFF800000> : vector<5xf32>
    %59 = vector.multi_reduction <maximumf>, %58, %cst_20 [1] : vector<5x5xf32> to vector<5xf32>
    %60 = vector.shape_cast %59 : vector<5xf32> to vector<5x1xf32>
    %61 = vector.broadcast %60 : vector<5x1xf32> to vector<5x5xf32>
    %62 = arith.subf %58, %61 : vector<5x5xf32>
    %63 = math.exp %62 : vector<5x5xf32>
    %cst_21 = arith.constant dense<0.000000e+00> : vector<5xf32>
    %64 = vector.multi_reduction <add>, %63, %cst_21 [1] : vector<5x5xf32> to vector<5xf32>
    %65 = vector.shape_cast %64 : vector<5xf32> to vector<5x1xf32>
    %66 = tpu.reciprocal %65 {approx = true} : vector<5x1xf32> -> vector<5x1xf32>
    %67 = vector.broadcast %66 : vector<5x1xf32> to vector<5x5xf32>
    %68 = arith.mulf %63, %67 : vector<5x5xf32>
    %69 = arith.truncf %68 : vector<5x5xf32> to vector<5x5xbf16>
    %cst_22 = arith.constant dense<0.000000e+00> : vector<5x8xf32>
    %70 = tpu.matmul %69, %57, %cst_22 {dimension_numbers = #tpu.dot_dimension_numbers<[1], [0], [0], [1], [0, 0, 1, 1], [], []>} : vector<5x5xbf16>, vector<5x8xbf16>, vector<5x8xf32> -> vector<5x8xf32>
    %71 = vector.extract_strided_slice %32 {offsets = [0, 16], sizes = [5, 8], strides = [1, 1]} : vector<5x96xf32> to vector<5x8xf32>
    %72 = arith.truncf %71 : vector<5x8xf32> to vector<5x8xbf16>
    %73 = vector.extract_strided_slice %32 {offsets = [0, 48], sizes = [5, 8], strides = [1, 1]} : vector<5x96xf32> to vector<5x8xf32>
    %74 = arith.truncf %73 : vector<5x8xf32> to vector<5x8xbf16>
    %75 = vector.extract_strided_slice %32 {offsets = [0, 80], sizes = [5, 8], strides = [1, 1]} : vector<5x96xf32> to vector<5x8xf32>
    %76 = arith.truncf %75 : vector<5x8xf32> to vector<5x8xbf16>
    %cst_23 = arith.constant dense<0.000000e+00> : vector<5x5xf32>
    %77 = tpu.matmul %72, %74, %cst_23 {dimension_numbers = #tpu.dot_dimension_numbers<[1], [1], [0], [0], [0, 0, 1, 0], [], []>} : vector<5x8xbf16>, vector<5x8xbf16>, vector<5x5xf32> -> vector<5x5xf32>
    %cst_24 = arith.constant dense<0xFF800000> : vector<5xf32>
    %78 = vector.multi_reduction <maximumf>, %77, %cst_24 [1] : vector<5x5xf32> to vector<5xf32>
    %79 = vector.shape_cast %78 : vector<5xf32> to vector<5x1xf32>
    %80 = vector.broadcast %79 : vector<5x1xf32> to vector<5x5xf32>
    %81 = arith.subf %77, %80 : vector<5x5xf32>
    %82 = math.exp %81 : vector<5x5xf32>
    %cst_25 = arith.constant dense<0.000000e+00> : vector<5xf32>
    %83 = vector.multi_reduction <add>, %82, %cst_25 [1] : vector<5x5xf32> to vector<5xf32>
    %84 = vector.shape_cast %83 : vector<5xf32> to vector<5x1xf32>
    %85 = tpu.reciprocal %84 {approx = true} : vector<5x1xf32> -> vector<5x1xf32>
    %86 = vector.broadcast %85 : vector<5x1xf32> to vector<5x5xf32>
    %87 = arith.mulf %82, %86 : vector<5x5xf32>
    %88 = arith.truncf %87 : vector<5x5xf32> to vector<5x5xbf16>
    %cst_26 = arith.constant dense<0.000000e+00> : vector<5x8xf32>
    %89 = tpu.matmul %88, %76, %cst_26 {dimension_numbers = #tpu.dot_dimension_numbers<[1], [0], [0], [1], [0, 0, 1, 1], [], []>} : vector<5x5xbf16>, vector<5x8xbf16>, vector<5x8xf32> -> vector<5x8xf32>
    %90 = vector.extract_strided_slice %32 {offsets = [0, 24], sizes = [5, 8], strides = [1, 1]} : vector<5x96xf32> to vector<5x8xf32>
    %91 = arith.truncf %90 : vector<5x8xf32> to vector<5x8xbf16>
    %92 = vector.extract_strided_slice %32 {offsets = [0, 56], sizes = [5, 8], strides = [1, 1]} : vector<5x96xf32> to vector<5x8xf32>
    %93 = arith.truncf %92 : vector<5x8xf32> to vector<5x8xbf16>
    %94 = vector.extract_strided_slice %32 {offsets = [0, 88], sizes = [5, 8], strides = [1, 1]} : vector<5x96xf32> to vector<5x8xf32>
    %95 = arith.truncf %94 : vector<5x8xf32> to vector<5x8xbf16>
    %cst_27 = arith.constant dense<0.000000e+00> : vector<5x5xf32>
    %96 = tpu.matmul %91, %93, %cst_27 {dimension_numbers = #tpu.dot_dimension_numbers<[1], [1], [0], [0], [0, 0, 1, 0], [], []>} : vector<5x8xbf16>, vector<5x8xbf16>, vector<5x5xf32> -> vector<5x5xf32>
    %cst_28 = arith.constant dense<0xFF800000> : vector<5xf32>
    %97 = vector.multi_reduction <maximumf>, %96, %cst_28 [1] : vector<5x5xf32> to vector<5xf32>
    %98 = vector.shape_cast %97 : vector<5xf32> to vector<5x1xf32>
    %99 = vector.broadcast %98 : vector<5x1xf32> to vector<5x5xf32>
    %100 = arith.subf %96, %99 : vector<5x5xf32>
    %101 = math.exp %100 : vector<5x5xf32>
    %cst_29 = arith.constant dense<0.000000e+00> : vector<5xf32>
    %102 = vector.multi_reduction <add>, %101, %cst_29 [1] : vector<5x5xf32> to vector<5xf32>
    %103 = vector.shape_cast %102 : vector<5xf32> to vector<5x1xf32>
    %104 = tpu.reciprocal %103 {approx = true} : vector<5x1xf32> -> vector<5x1xf32>
    %105 = vector.broadcast %104 : vector<5x1xf32> to vector<5x5xf32>
    %106 = arith.mulf %101, %105 : vector<5x5xf32>
    %107 = arith.truncf %106 : vector<5x5xf32> to vector<5x5xbf16>
    %cst_30 = arith.constant dense<0.000000e+00> : vector<5x8xf32>
    %108 = tpu.matmul %107, %95, %cst_30 {dimension_numbers = #tpu.dot_dimension_numbers<[1], [0], [0], [1], [0, 0, 1, 1], [], []>} : vector<5x5xbf16>, vector<5x8xbf16>, vector<5x8xf32> -> vector<5x8xf32>
    %109 = tpu.concatenate %51, %70, %89, %108 in 1 : vector<5x8xf32>, vector<5x8xf32>, vector<5x8xf32>, vector<5x8xf32> -> vector<5x32xf32>
    %110 = arith.truncf %109 : vector<5x32xf32> to vector<5x32xbf16>
    %c0_31 = arith.constant 0 : index
    %c0_32 = arith.constant 0 : index
    %111 = vector.load %arg6[%c0_31, %c0_32] : memref<32x32xbf16, #tpu.memory_space<vmem>>, vector<32x32xbf16>
    %cst_33 = arith.constant dense<0.000000e+00> : vector<5x32xf32>
    %112 = tpu.matmul %110, %111, %cst_33 {dimension_numbers = #tpu.dot_dimension_numbers<[1], [0], [0], [1], [0, 0, 1, 1], [], []>} : vector<5x32xbf16>, vector<32x32xbf16>, vector<5x32xf32> -> vector<5x32xf32>
    %c0_34 = arith.constant 0 : index
    %c0_35 = arith.constant 0 : index
    %113 = vector.load %arg7[%c0_34, %c0_35] : memref<1x32xf32, #tpu.memory_space<vmem>>, vector<1x32xf32>
    %114 = vector.broadcast %113 : vector<1x32xf32> to vector<5x32xf32>
    %115 = arith.addf %112, %114 : vector<5x32xf32>
    %116 = arith.addf %2, %115 : vector<5x32xf32>
    %c0_36 = arith.constant 0 : index
    %c0_37 = arith.constant 0 : index
    %117 = vector.load %arg8[%c0_36, %c0_37] : memref<1x32xf32, #tpu.memory_space<vmem>>, vector<1x32xf32>
    %c0_38 = arith.constant 0 : index
    %c0_39 = arith.constant 0 : index
    %118 = vector.load %arg9[%c0_38, %c0_39] : memref<1x32xf32, #tpu.memory_space<vmem>>, vector<1x32xf32>
    %cst_40 = arith.constant dense<0.000000e+00> : vector<5xf32>
    %119 = vector.multi_reduction <add>, %116, %cst_40 [1] : vector<5x32xf32> to vector<5xf32>
    %120 = vector.shape_cast %119 : vector<5xf32> to vector<5x1xf32>
    %cst_41 = arith.constant 3.200000e+01 : f32
    %121 = vector.broadcast %cst_41 : f32 to vector<5x1xf32>
    %122 = arith.divf %120, %121 : vector<5x1xf32>
    %123 = vector.broadcast %122 : vector<5x1xf32> to vector<5x32xf32>
    %124 = arith.subf %116, %123 : vector<5x32xf32>
    %125 = arith.mulf %124, %124 : vector<5x32xf32>
    %cst_42 = arith.constant dense<0.000000e+00> : vector<5xf32>
    %126 = vector.multi_reduction <add>, %125, %cst_42 [1] : vector<5x32xf32> to vector<5xf32>
    %127 = vector.shape_cast %126 : vector<5xf32> to vector<5x1xf32>
    %cst_43 = arith.constant 3.200000e+01 : f32
    %128 = vector.broadcast %cst_43 : f32 to vector<5x1xf32>
    %129 = arith.divf %127, %128 : vector<5x1xf32>
    %130 = vector.broadcast %122 : vector<5x1xf32> to vector<5x32xf32>
    %131 = arith.subf %116, %130 : vector<5x32xf32>
    %cst_44 = arith.constant 9.99999974E-6 : f32
    %132 = vector.broadcast %cst_44 : f32 to vector<5x1xf32>
    %133 = arith.addf %129, %132 : vector<5x1xf32>
    %134 = math.rsqrt %133 : vector<5x1xf32>
    %135 = vector.broadcast %134 : vector<5x1xf32> to vector<5x32xf32>
    %136 = arith.mulf %131, %135 : vector<5x32xf32>
    %137 = vector.broadcast %117 : vector<1x32xf32> to vector<5x32xf32>
    %138 = arith.mulf %136, %137 : vector<5x32xf32>
    %139 = vector.broadcast %118 : vector<1x32xf32> to vector<5x32xf32>
    %140 = arith.addf %138, %139 : vector<5x32xf32>
    %141 = arith.truncf %140 : vector<5x32xf32> to vector<5x32xbf16>
    %c0_45 = arith.constant 0 : index
    %c0_46 = arith.constant 0 : index
    %142 = vector.load %arg10[%c0_45, %c0_46] : memref<32x64xbf16, #tpu.memory_space<vmem>>, vector<32x64xbf16>
    %cst_47 = arith.constant dense<0.000000e+00> : vector<5x64xf32>
    %143 = tpu.matmul %141, %142, %cst_47 {dimension_numbers = #tpu.dot_dimension_numbers<[1], [0], [0], [1], [0, 0, 1, 1], [], []>} : vector<5x32xbf16>, vector<32x64xbf16>, vector<5x64xf32> -> vector<5x64xf32>
    %c0_48 = arith.constant 0 : index
    %c0_49 = arith.constant 0 : index
    %144 = vector.load %arg11[%c0_48, %c0_49] : memref<1x64xf32, #tpu.memory_space<vmem>>, vector<1x64xf32>
    %145 = vector.broadcast %144 : vector<1x64xf32> to vector<5x64xf32>
    %146 = arith.addf %143, %145 : vector<5x64xf32>
    %cst_50 = arith.constant 1.702000e+00 : f32
    %147 = vector.broadcast %cst_50 : f32 to vector<5x64xf32>
    %148 = arith.mulf %147, %146 : vector<5x64xf32>
    %149 = arith.negf %148 : vector<5x64xf32>
    %150 = math.exp %149 : vector<5x64xf32>
    %cst_51 = arith.constant 1.000000e+00 : f32
    %151 = vector.broadcast %cst_51 : f32 to vector<5x64xf32>
    %152 = arith.addf %151, %150 : vector<5x64xf32>
    %153 = arith.divf %151, %152 : vector<5x64xf32>
    %154 = arith.mulf %146, %153 : vector<5x64xf32>
    %155 = arith.truncf %154 : vector<5x64xf32> to vector<5x64xbf16>
    %c0_52 = arith.constant 0 : index
    %c0_53 = arith.constant 0 : index
    %156 = vector.load %arg12[%c0_52, %c0_53] : memref<64x32xbf16, #tpu.memory_space<vmem>>, vector<64x32xbf16>
    %cst_54 = arith.constant dense<0.000000e+00> : vector<5x32xf32>
    %157 = tpu.matmul %155, %156, %cst_54 {dimension_numbers = #tpu.dot_dimension_numbers<[1], [0], [0], [1], [0, 0, 1, 1], [], []>} : vector<5x64xbf16>, vector<64x32xbf16>, vector<5x32xf32> -> vector<5x32xf32>
    %c0_55 = arith.constant 0 : index
    %c0_56 = arith.constant 0 : index
    %158 = vector.load %arg13[%c0_55, %c0_56] : memref<1x32xf32, #tpu.memory_space<vmem>>, vector<1x32xf32>
    %159 = vector.broadcast %158 : vector<1x32xf32> to vector<5x32xf32>
    %160 = arith.addf %157, %159 : vector<5x32xf32>
    %161 = arith.addf %116, %160 : vector<5x32xf32>
    %162 = arith.truncf %161 : vector<5x32xf32> to vector<5x32xbf16>
    %c0_57 = arith.constant 0 : index
    %c0_58 = arith.constant 0 : index
    %c0_59 = arith.constant 0 : index
    %163 = vector.load %arg14[%c0_57, %c0_58, %c0_59] : memref<1x5x32xbf16, #tpu.memory_space<vmem>>, vector<1x5x32xbf16>
    %164 = vector.shape_cast %163 : vector<1x5x32xbf16> to vector<5x32xbf16>
    %165 = vector.shape_cast %162 : vector<5x32xbf16> to vector<1x5x32xbf16>
    tpu.vector_store %arg14[%c0_57, %c0_58, %c0_59], %165 {strides = array<i32>} : memref<1x5x32xbf16, #tpu.memory_space<vmem>>, vector<1x5x32xbf16>,
    return
  }
  func.func @transform_0(%arg0: i32) -> (i32, i32, i32) {
    %c0_i32 = arith.constant 0 : i32
    %c0_i32_0 = arith.constant 0 : i32
    %c0_i32_1 = arith.constant 0 : i32
    return %arg0, %c0_i32, %c0_i32_0 : i32, i32, i32
  }
  func.func @transform_1(%arg0: i32) -> (i32, i32) {
    %c0_i32 = arith.constant 0 : i32
    %c0_i32_0 = arith.constant 0 : i32
    %c0_i32_1 = arith.constant 0 : i32
    return %c0_i32, %c0_i32_0 : i32, i32
  }
  func.func @transform_2(%arg0: i32) -> (i32, i32) {
    %c0_i32 = arith.constant 0 : i32
    %c0_i32_0 = arith.constant 0 : i32
    %c0_i32_1 = arith.constant 0 : i32
    return %c0_i32, %c0_i32_0 : i32, i32
  }
  func.func @transform_3(%arg0: i32) -> (i32, i32) {
    %c0_i32 = arith.constant 0 : i32
    %c0_i32_0 = arith.constant 0 : i32
    %c0_i32_1 = arith.constant 0 : i32
    return %c0_i32, %c0_i32_0 : i32, i32
  }
  func.func @transform_4(%arg0: i32) -> (i32, i32) {
    %c0_i32 = arith.constant 0 : i32
    %c0_i32_0 = arith.constant 0 : i32
    %c0_i32_1 = arith.constant 0 : i32
    return %c0_i32, %c0_i32_0 : i32, i32
  }
  func.func @transform_5(%arg0: i32) -> (i32, i32) {
    %c0_i32 = arith.constant 0 : i32
    %c0_i32_0 = arith.constant 0 : i32
    %c0_i32_1 = arith.constant 0 : i32
    return %c0_i32, %c0_i32_0 : i32, i32
  }
  func.func @transform_6(%arg0: i32) -> (i32, i32) {
    %c0_i32 = arith.constant 0 : i32
    %c0_i32_0 = arith.constant 0 : i32
    %c0_i32_1 = arith.constant 0 : i32
    return %c0_i32, %c0_i32_0 : i32, i32
  }
  func.func @transform_7(%arg0: i32) -> (i32, i32) {
    %c0_i32 = arith.constant 0 : i32
    %c0_i32_0 = arith.constant 0 : i32
    %c0_i32_1 = arith.constant 0 : i32
    return %c0_i32, %c0_i32_0 : i32, i32
  }
  func.func @transform_8(%arg0: i32) -> (i32, i32) {
    %c0_i32 = arith.constant 0 : i32
    %c0_i32_0 = arith.constant 0 : i32
    %c0_i32_1 = arith.constant 0 : i32
    return %c0_i32, %c0_i32_0 : i32, i32
  }
  func.func @transform_9(%arg0: i32) -> (i32, i32) {
    %c0_i32 = arith.constant 0 : i32
    %c0_i32_0 = arith.constant 0 : i32
    %c0_i32_1 = arith.constant 0 : i32
    return %c0_i32, %c0_i32_0 : i32, i32
  }
  func.func @transform_10(%arg0: i32) -> (i32, i32) {
    %c0_i32 = arith.constant 0 : i32
    %c0_i32_0 = arith.constant 0 : i32
    %c0_i32_1 = arith.constant 0 : i32
    return %c0_i32, %c0_i32_0 : i32, i32
  }
  func.func @transform_11(%arg0: i32) -> (i32, i32) {
    %c0_i32 = arith.constant 0 : i32
    %c0_i32_0 = arith.constant 0 : i32
    %c0_i32_1 = arith.constant 0 : i32
    return %c0_i32, %c0_i32_0 : i32, i32
  }
  func.func @transform_12(%arg0: i32) -> (i32, i32) {
    %c0_i32 = arith.constant 0 : i32
    %c0_i32_0 = arith.constant 0 : i32
    %c0_i32_1 = arith.constant 0 : i32
    return %c0_i32, %c0_i32_0 : i32, i32
  }
  func.func @transform_13(%arg0: i32) -> (i32, i32, i32) {
    %c0_i32 = arith.constant 0 : i32
    %c0_i32_0 = arith.constant 0 : i32
    %c0_i32_1 = arith.constant 0 : i32
    return %arg0, %c0_i32, %c0_i32_0 : i32, i32, i32
  }
}

module attributes {stable_mosaic.version = 11 : i64} {
  func.func @_last_layer_kernel(%arg0: i32, %arg1: memref<1x5x32xbf16, #tpu.memory_space<vmem>>, %arg2: memref<1x32xf32, #tpu.memory_space<vmem>>, %arg3: memref<1x32xf32, #tpu.memory_space<vmem>>, %arg4: memref<32x96xbf16, #tpu.memory_space<vmem>>, %arg5: memref<1x96xf32, #tpu.memory_space<vmem>>, %arg6: memref<32x32xbf16, #tpu.memory_space<vmem>>, %arg7: memref<1x32xf32, #tpu.memory_space<vmem>>, %arg8: memref<1x32xf32, #tpu.memory_space<vmem>>, %arg9: memref<1x32xf32, #tpu.memory_space<vmem>>, %arg10: memref<32x64xbf16, #tpu.memory_space<vmem>>, %arg11: memref<1x64xf32, #tpu.memory_space<vmem>>, %arg12: memref<64x32xbf16, #tpu.memory_space<vmem>>, %arg13: memref<1x32xf32, #tpu.memory_space<vmem>>, %arg14: memref<1x32xf32, #tpu.memory_space<vmem>>, %arg15: memref<1x32xf32, #tpu.memory_space<vmem>>, %arg16: memref<32x24xbf16, #tpu.memory_space<vmem>>, %arg17: memref<1x1x24xf32, #tpu.memory_space<vmem>>) attributes {dimension_semantics = [#tpu.dimension_semantics<parallel>], iteration_bounds = array<i64: 2>, scalar_prefetch = 0 : i64, scratch_operands = 0 : i64, tpu.core_type = #tpu.core_type<tc>, window_params = [{transform_indices = @transform_0, window_bounds = array<i64: 1, 5, 32>}, {pipeline_mode = #tpu.pipeline_mode<synchronous>, transform_indices = @transform_1, window_bounds = array<i64: 1, 32>}, {pipeline_mode = #tpu.pipeline_mode<synchronous>, transform_indices = @transform_2, window_bounds = array<i64: 1, 32>}, {pipeline_mode = #tpu.pipeline_mode<synchronous>, transform_indices = @transform_3, window_bounds = array<i64: 32, 96>}, {pipeline_mode = #tpu.pipeline_mode<synchronous>, transform_indices = @transform_4, window_bounds = array<i64: 1, 96>}, {pipeline_mode = #tpu.pipeline_mode<synchronous>, transform_indices = @transform_5, window_bounds = array<i64: 32, 32>}, {pipeline_mode = #tpu.pipeline_mode<synchronous>, transform_indices = @transform_6, window_bounds = array<i64: 1, 32>}, {pipeline_mode = #tpu.pipeline_mode<synchronous>, transform_indices = @transform_7, window_bounds = array<i64: 1, 32>}, {pipeline_mode = #tpu.pipeline_mode<synchronous>, transform_indices = @transform_8, window_bounds = array<i64: 1, 32>}, {pipeline_mode = #tpu.pipeline_mode<synchronous>, transform_indices = @transform_9, window_bounds = array<i64: 32, 64>}, {pipeline_mode = #tpu.pipeline_mode<synchronous>, transform_indices = @transform_10, window_bounds = array<i64: 1, 64>}, {pipeline_mode = #tpu.pipeline_mode<synchronous>, transform_indices = @transform_11, window_bounds = array<i64: 64, 32>}, {pipeline_mode = #tpu.pipeline_mode<synchronous>, transform_indices = @transform_12, window_bounds = array<i64: 1, 32>}, {pipeline_mode = #tpu.pipeline_mode<synchronous>, transform_indices = @transform_13, window_bounds = array<i64: 1, 32>}, {pipeline_mode = #tpu.pipeline_mode<synchronous>, transform_indices = @transform_14, window_bounds = array<i64: 1, 32>}, {pipeline_mode = #tpu.pipeline_mode<synchronous>, transform_indices = @transform_15, window_bounds = array<i64: 32, 24>}, {transform_indices = @transform_16, window_bounds = array<i64: 1, 1, 24>}]} {
    %c0 = arith.constant 0 : index
    %c0_0 = arith.constant 0 : index
    %c0_1 = arith.constant 0 : index
    %0 = vector.load %arg1[%c0, %c0_0, %c0_1] : memref<1x5x32xbf16, #tpu.memory_space<vmem>>, vector<1x5x32xbf16>
    %1 = vector.shape_cast %0 : vector<1x5x32xbf16> to vector<5x32xbf16>
    %2 = arith.extf %1 : vector<5x32xbf16> to vector<5x32xf32>
    %c0_2 = arith.constant 0 : index
    %c0_3 = arith.constant 0 : index
    %3 = vector.load %arg2[%c0_2, %c0_3] : memref<1x32xf32, #tpu.memory_space<vmem>>, vector<1x32xf32>
    %c0_4 = arith.constant 0 : index
    %c0_5 = arith.constant 0 : index
    %4 = vector.load %arg3[%c0_4, %c0_5] : memref<1x32xf32, #tpu.memory_space<vmem>>, vector<1x32xf32>
    %cst = arith.constant dense<0.000000e+00> : vector<5xf32>
    %5 = vector.multi_reduction <add>, %2, %cst [1] : vector<5x32xf32> to vector<5xf32>
    %6 = vector.shape_cast %5 : vector<5xf32> to vector<5x1xf32>
    %cst_6 = arith.constant 3.200000e+01 : f32
    %7 = vector.broadcast %cst_6 : f32 to vector<5x1xf32>
    %8 = arith.divf %6, %7 : vector<5x1xf32>
    %9 = vector.broadcast %8 : vector<5x1xf32> to vector<5x32xf32>
    %10 = arith.subf %2, %9 : vector<5x32xf32>
    %11 = arith.mulf %10, %10 : vector<5x32xf32>
    %cst_7 = arith.constant dense<0.000000e+00> : vector<5xf32>
    %12 = vector.multi_reduction <add>, %11, %cst_7 [1] : vector<5x32xf32> to vector<5xf32>
    %13 = vector.shape_cast %12 : vector<5xf32> to vector<5x1xf32>
    %cst_8 = arith.constant 3.200000e+01 : f32
    %14 = vector.broadcast %cst_8 : f32 to vector<5x1xf32>
    %15 = arith.divf %13, %14 : vector<5x1xf32>
    %16 = vector.broadcast %8 : vector<5x1xf32> to vector<5x32xf32>
    %17 = arith.subf %2, %16 : vector<5x32xf32>
    %cst_9 = arith.constant 9.99999974E-6 : f32
    %18 = vector.broadcast %cst_9 : f32 to vector<5x1xf32>
    %19 = arith.addf %15, %18 : vector<5x1xf32>
    %20 = math.rsqrt %19 : vector<5x1xf32>
    %21 = vector.broadcast %20 : vector<5x1xf32> to vector<5x32xf32>
    %22 = arith.mulf %17, %21 : vector<5x32xf32>
    %23 = vector.broadcast %3 : vector<1x32xf32> to vector<5x32xf32>
    %24 = arith.mulf %22, %23 : vector<5x32xf32>
    %25 = vector.broadcast %4 : vector<1x32xf32> to vector<5x32xf32>
    %26 = arith.addf %24, %25 : vector<5x32xf32>
    %27 = arith.truncf %26 : vector<5x32xf32> to vector<5x32xbf16>
    %c0_10 = arith.constant 0 : index
    %c0_11 = arith.constant 0 : index
    %28 = vector.load %arg4[%c0_10, %c0_11] : memref<32x96xbf16, #tpu.memory_space<vmem>>, vector<32x96xbf16>
    %cst_12 = arith.constant dense<0.000000e+00> : vector<5x96xf32>
    %29 = tpu.matmul %27, %28, %cst_12 {dimension_numbers = #tpu.dot_dimension_numbers<[1], [0], [0], [1], [0, 0, 1, 1], [], []>} : vector<5x32xbf16>, vector<32x96xbf16>, vector<5x96xf32> -> vector<5x96xf32>
    %c0_13 = arith.constant 0 : index
    %c0_14 = arith.constant 0 : index
    %30 = vector.load %arg5[%c0_13, %c0_14] : memref<1x96xf32, #tpu.memory_space<vmem>>, vector<1x96xf32>
    %31 = vector.broadcast %30 : vector<1x96xf32> to vector<5x96xf32>
    %32 = arith.addf %29, %31 : vector<5x96xf32>
    %33 = vector.extract_strided_slice %32 {offsets = [0, 0], sizes = [5, 8], strides = [1, 1]} : vector<5x96xf32> to vector<5x8xf32>
    %34 = arith.truncf %33 : vector<5x8xf32> to vector<5x8xbf16>
    %35 = vector.extract_strided_slice %32 {offsets = [0, 32], sizes = [5, 8], strides = [1, 1]} : vector<5x96xf32> to vector<5x8xf32>
    %36 = arith.truncf %35 : vector<5x8xf32> to vector<5x8xbf16>
    %37 = vector.extract_strided_slice %32 {offsets = [0, 64], sizes = [5, 8], strides = [1, 1]} : vector<5x96xf32> to vector<5x8xf32>
    %38 = arith.truncf %37 : vector<5x8xf32> to vector<5x8xbf16>
    %cst_15 = arith.constant dense<0.000000e+00> : vector<5x5xf32>
    %39 = tpu.matmul %34, %36, %cst_15 {dimension_numbers = #tpu.dot_dimension_numbers<[1], [1], [0], [0], [0, 0, 1, 0], [], []>} : vector<5x8xbf16>, vector<5x8xbf16>, vector<5x5xf32> -> vector<5x5xf32>
    %cst_16 = arith.constant dense<0xFF800000> : vector<5xf32>
    %40 = vector.multi_reduction <maximumf>, %39, %cst_16 [1] : vector<5x5xf32> to vector<5xf32>
    %41 = vector.shape_cast %40 : vector<5xf32> to vector<5x1xf32>
    %42 = vector.broadcast %41 : vector<5x1xf32> to vector<5x5xf32>
    %43 = arith.subf %39, %42 : vector<5x5xf32>
    %44 = math.exp %43 : vector<5x5xf32>
    %cst_17 = arith.constant dense<0.000000e+00> : vector<5xf32>
    %45 = vector.multi_reduction <add>, %44, %cst_17 [1] : vector<5x5xf32> to vector<5xf32>
    %46 = vector.shape_cast %45 : vector<5xf32> to vector<5x1xf32>
    %47 = tpu.reciprocal %46 {approx = true} : vector<5x1xf32> -> vector<5x1xf32>
    %48 = vector.broadcast %47 : vector<5x1xf32> to vector<5x5xf32>
    %49 = arith.mulf %44, %48 : vector<5x5xf32>
    %50 = arith.truncf %49 : vector<5x5xf32> to vector<5x5xbf16>
    %cst_18 = arith.constant dense<0.000000e+00> : vector<5x8xf32>
    %51 = tpu.matmul %50, %38, %cst_18 {dimension_numbers = #tpu.dot_dimension_numbers<[1], [0], [0], [1], [0, 0, 1, 1], [], []>} : vector<5x5xbf16>, vector<5x8xbf16>, vector<5x8xf32> -> vector<5x8xf32>
    %52 = vector.extract_strided_slice %32 {offsets = [0, 8], sizes = [5, 8], strides = [1, 1]} : vector<5x96xf32> to vector<5x8xf32>
    %53 = arith.truncf %52 : vector<5x8xf32> to vector<5x8xbf16>
    %54 = vector.extract_strided_slice %32 {offsets = [0, 40], sizes = [5, 8], strides = [1, 1]} : vector<5x96xf32> to vector<5x8xf32>
    %55 = arith.truncf %54 : vector<5x8xf32> to vector<5x8xbf16>
    %56 = vector.extract_strided_slice %32 {offsets = [0, 72], sizes = [5, 8], strides = [1, 1]} : vector<5x96xf32> to vector<5x8xf32>
    %57 = arith.truncf %56 : vector<5x8xf32> to vector<5x8xbf16>
    %cst_19 = arith.constant dense<0.000000e+00> : vector<5x5xf32>
    %58 = tpu.matmul %53, %55, %cst_19 {dimension_numbers = #tpu.dot_dimension_numbers<[1], [1], [0], [0], [0, 0, 1, 0], [], []>} : vector<5x8xbf16>, vector<5x8xbf16>, vector<5x5xf32> -> vector<5x5xf32>
    %cst_20 = arith.constant dense<0xFF800000> : vector<5xf32>
    %59 = vector.multi_reduction <maximumf>, %58, %cst_20 [1] : vector<5x5xf32> to vector<5xf32>
    %60 = vector.shape_cast %59 : vector<5xf32> to vector<5x1xf32>
    %61 = vector.broadcast %60 : vector<5x1xf32> to vector<5x5xf32>
    %62 = arith.subf %58, %61 : vector<5x5xf32>
    %63 = math.exp %62 : vector<5x5xf32>
    %cst_21 = arith.constant dense<0.000000e+00> : vector<5xf32>
    %64 = vector.multi_reduction <add>, %63, %cst_21 [1] : vector<5x5xf32> to vector<5xf32>
    %65 = vector.shape_cast %64 : vector<5xf32> to vector<5x1xf32>
    %66 = tpu.reciprocal %65 {approx = true} : vector<5x1xf32> -> vector<5x1xf32>
    %67 = vector.broadcast %66 : vector<5x1xf32> to vector<5x5xf32>
    %68 = arith.mulf %63, %67 : vector<5x5xf32>
    %69 = arith.truncf %68 : vector<5x5xf32> to vector<5x5xbf16>
    %cst_22 = arith.constant dense<0.000000e+00> : vector<5x8xf32>
    %70 = tpu.matmul %69, %57, %cst_22 {dimension_numbers = #tpu.dot_dimension_numbers<[1], [0], [0], [1], [0, 0, 1, 1], [], []>} : vector<5x5xbf16>, vector<5x8xbf16>, vector<5x8xf32> -> vector<5x8xf32>
    %71 = vector.extract_strided_slice %32 {offsets = [0, 16], sizes = [5, 8], strides = [1, 1]} : vector<5x96xf32> to vector<5x8xf32>
    %72 = arith.truncf %71 : vector<5x8xf32> to vector<5x8xbf16>
    %73 = vector.extract_strided_slice %32 {offsets = [0, 48], sizes = [5, 8], strides = [1, 1]} : vector<5x96xf32> to vector<5x8xf32>
    %74 = arith.truncf %73 : vector<5x8xf32> to vector<5x8xbf16>
    %75 = vector.extract_strided_slice %32 {offsets = [0, 80], sizes = [5, 8], strides = [1, 1]} : vector<5x96xf32> to vector<5x8xf32>
    %76 = arith.truncf %75 : vector<5x8xf32> to vector<5x8xbf16>
    %cst_23 = arith.constant dense<0.000000e+00> : vector<5x5xf32>
    %77 = tpu.matmul %72, %74, %cst_23 {dimension_numbers = #tpu.dot_dimension_numbers<[1], [1], [0], [0], [0, 0, 1, 0], [], []>} : vector<5x8xbf16>, vector<5x8xbf16>, vector<5x5xf32> -> vector<5x5xf32>
    %cst_24 = arith.constant dense<0xFF800000> : vector<5xf32>
    %78 = vector.multi_reduction <maximumf>, %77, %cst_24 [1] : vector<5x5xf32> to vector<5xf32>
    %79 = vector.shape_cast %78 : vector<5xf32> to vector<5x1xf32>
    %80 = vector.broadcast %79 : vector<5x1xf32> to vector<5x5xf32>
    %81 = arith.subf %77, %80 : vector<5x5xf32>
    %82 = math.exp %81 : vector<5x5xf32>
    %cst_25 = arith.constant dense<0.000000e+00> : vector<5xf32>
    %83 = vector.multi_reduction <add>, %82, %cst_25 [1] : vector<5x5xf32> to vector<5xf32>
    %84 = vector.shape_cast %83 : vector<5xf32> to vector<5x1xf32>
    %85 = tpu.reciprocal %84 {approx = true} : vector<5x1xf32> -> vector<5x1xf32>
    %86 = vector.broadcast %85 : vector<5x1xf32> to vector<5x5xf32>
    %87 = arith.mulf %82, %86 : vector<5x5xf32>
    %88 = arith.truncf %87 : vector<5x5xf32> to vector<5x5xbf16>
    %cst_26 = arith.constant dense<0.000000e+00> : vector<5x8xf32>
    %89 = tpu.matmul %88, %76, %cst_26 {dimension_numbers = #tpu.dot_dimension_numbers<[1], [0], [0], [1], [0, 0, 1, 1], [], []>} : vector<5x5xbf16>, vector<5x8xbf16>, vector<5x8xf32> -> vector<5x8xf32>
    %90 = vector.extract_strided_slice %32 {offsets = [0, 24], sizes = [5, 8], strides = [1, 1]} : vector<5x96xf32> to vector<5x8xf32>
    %91 = arith.truncf %90 : vector<5x8xf32> to vector<5x8xbf16>
    %92 = vector.extract_strided_slice %32 {offsets = [0, 56], sizes = [5, 8], strides = [1, 1]} : vector<5x96xf32> to vector<5x8xf32>
    %93 = arith.truncf %92 : vector<5x8xf32> to vector<5x8xbf16>
    %94 = vector.extract_strided_slice %32 {offsets = [0, 88], sizes = [5, 8], strides = [1, 1]} : vector<5x96xf32> to vector<5x8xf32>
    %95 = arith.truncf %94 : vector<5x8xf32> to vector<5x8xbf16>
    %cst_27 = arith.constant dense<0.000000e+00> : vector<5x5xf32>
    %96 = tpu.matmul %91, %93, %cst_27 {dimension_numbers = #tpu.dot_dimension_numbers<[1], [1], [0], [0], [0, 0, 1, 0], [], []>} : vector<5x8xbf16>, vector<5x8xbf16>, vector<5x5xf32> -> vector<5x5xf32>
    %cst_28 = arith.constant dense<0xFF800000> : vector<5xf32>
    %97 = vector.multi_reduction <maximumf>, %96, %cst_28 [1] : vector<5x5xf32> to vector<5xf32>
    %98 = vector.shape_cast %97 : vector<5xf32> to vector<5x1xf32>
    %99 = vector.broadcast %98 : vector<5x1xf32> to vector<5x5xf32>
    %100 = arith.subf %96, %99 : vector<5x5xf32>
    %101 = math.exp %100 : vector<5x5xf32>
    %cst_29 = arith.constant dense<0.000000e+00> : vector<5xf32>
    %102 = vector.multi_reduction <add>, %101, %cst_29 [1] : vector<5x5xf32> to vector<5xf32>
    %103 = vector.shape_cast %102 : vector<5xf32> to vector<5x1xf32>
    %104 = tpu.reciprocal %103 {approx = true} : vector<5x1xf32> -> vector<5x1xf32>
    %105 = vector.broadcast %104 : vector<5x1xf32> to vector<5x5xf32>
    %106 = arith.mulf %101, %105 : vector<5x5xf32>
    %107 = arith.truncf %106 : vector<5x5xf32> to vector<5x5xbf16>
    %cst_30 = arith.constant dense<0.000000e+00> : vector<5x8xf32>
    %108 = tpu.matmul %107, %95, %cst_30 {dimension_numbers = #tpu.dot_dimension_numbers<[1], [0], [0], [1], [0, 0, 1, 1], [], []>} : vector<5x5xbf16>, vector<5x8xbf16>, vector<5x8xf32> -> vector<5x8xf32>
    %109 = tpu.concatenate %51, %70, %89, %108 in 1 : vector<5x8xf32>, vector<5x8xf32>, vector<5x8xf32>, vector<5x8xf32> -> vector<5x32xf32>
    %110 = arith.truncf %109 : vector<5x32xf32> to vector<5x32xbf16>
    %c0_31 = arith.constant 0 : index
    %c0_32 = arith.constant 0 : index
    %111 = vector.load %arg6[%c0_31, %c0_32] : memref<32x32xbf16, #tpu.memory_space<vmem>>, vector<32x32xbf16>
    %cst_33 = arith.constant dense<0.000000e+00> : vector<5x32xf32>
    %112 = tpu.matmul %110, %111, %cst_33 {dimension_numbers = #tpu.dot_dimension_numbers<[1], [0], [0], [1], [0, 0, 1, 1], [], []>} : vector<5x32xbf16>, vector<32x32xbf16>, vector<5x32xf32> -> vector<5x32xf32>
    %c0_34 = arith.constant 0 : index
    %c0_35 = arith.constant 0 : index
    %113 = vector.load %arg7[%c0_34, %c0_35] : memref<1x32xf32, #tpu.memory_space<vmem>>, vector<1x32xf32>
    %114 = vector.broadcast %113 : vector<1x32xf32> to vector<5x32xf32>
    %115 = arith.addf %112, %114 : vector<5x32xf32>
    %116 = arith.addf %2, %115 : vector<5x32xf32>
    %c0_36 = arith.constant 0 : index
    %c0_37 = arith.constant 0 : index
    %117 = vector.load %arg8[%c0_36, %c0_37] : memref<1x32xf32, #tpu.memory_space<vmem>>, vector<1x32xf32>
    %c0_38 = arith.constant 0 : index
    %c0_39 = arith.constant 0 : index
    %118 = vector.load %arg9[%c0_38, %c0_39] : memref<1x32xf32, #tpu.memory_space<vmem>>, vector<1x32xf32>
    %cst_40 = arith.constant dense<0.000000e+00> : vector<5xf32>
    %119 = vector.multi_reduction <add>, %116, %cst_40 [1] : vector<5x32xf32> to vector<5xf32>
    %120 = vector.shape_cast %119 : vector<5xf32> to vector<5x1xf32>
    %cst_41 = arith.constant 3.200000e+01 : f32
    %121 = vector.broadcast %cst_41 : f32 to vector<5x1xf32>
    %122 = arith.divf %120, %121 : vector<5x1xf32>
    %123 = vector.broadcast %122 : vector<5x1xf32> to vector<5x32xf32>
    %124 = arith.subf %116, %123 : vector<5x32xf32>
    %125 = arith.mulf %124, %124 : vector<5x32xf32>
    %cst_42 = arith.constant dense<0.000000e+00> : vector<5xf32>
    %126 = vector.multi_reduction <add>, %125, %cst_42 [1] : vector<5x32xf32> to vector<5xf32>
    %127 = vector.shape_cast %126 : vector<5xf32> to vector<5x1xf32>
    %cst_43 = arith.constant 3.200000e+01 : f32
    %128 = vector.broadcast %cst_43 : f32 to vector<5x1xf32>
    %129 = arith.divf %127, %128 : vector<5x1xf32>
    %130 = vector.broadcast %122 : vector<5x1xf32> to vector<5x32xf32>
    %131 = arith.subf %116, %130 : vector<5x32xf32>
    %cst_44 = arith.constant 9.99999974E-6 : f32
    %132 = vector.broadcast %cst_44 : f32 to vector<5x1xf32>
    %133 = arith.addf %129, %132 : vector<5x1xf32>
    %134 = math.rsqrt %133 : vector<5x1xf32>
    %135 = vector.broadcast %134 : vector<5x1xf32> to vector<5x32xf32>
    %136 = arith.mulf %131, %135 : vector<5x32xf32>
    %137 = vector.broadcast %117 : vector<1x32xf32> to vector<5x32xf32>
    %138 = arith.mulf %136, %137 : vector<5x32xf32>
    %139 = vector.broadcast %118 : vector<1x32xf32> to vector<5x32xf32>
    %140 = arith.addf %138, %139 : vector<5x32xf32>
    %141 = arith.truncf %140 : vector<5x32xf32> to vector<5x32xbf16>
    %c0_45 = arith.constant 0 : index
    %c0_46 = arith.constant 0 : index
    %142 = vector.load %arg10[%c0_45, %c0_46] : memref<32x64xbf16, #tpu.memory_space<vmem>>, vector<32x64xbf16>
    %cst_47 = arith.constant dense<0.000000e+00> : vector<5x64xf32>
    %143 = tpu.matmul %141, %142, %cst_47 {dimension_numbers = #tpu.dot_dimension_numbers<[1], [0], [0], [1], [0, 0, 1, 1], [], []>} : vector<5x32xbf16>, vector<32x64xbf16>, vector<5x64xf32> -> vector<5x64xf32>
    %c0_48 = arith.constant 0 : index
    %c0_49 = arith.constant 0 : index
    %144 = vector.load %arg11[%c0_48, %c0_49] : memref<1x64xf32, #tpu.memory_space<vmem>>, vector<1x64xf32>
    %145 = vector.broadcast %144 : vector<1x64xf32> to vector<5x64xf32>
    %146 = arith.addf %143, %145 : vector<5x64xf32>
    %cst_50 = arith.constant 1.702000e+00 : f32
    %147 = vector.broadcast %cst_50 : f32 to vector<5x64xf32>
    %148 = arith.mulf %147, %146 : vector<5x64xf32>
    %149 = arith.negf %148 : vector<5x64xf32>
    %150 = math.exp %149 : vector<5x64xf32>
    %cst_51 = arith.constant 1.000000e+00 : f32
    %151 = vector.broadcast %cst_51 : f32 to vector<5x64xf32>
    %152 = arith.addf %151, %150 : vector<5x64xf32>
    %153 = arith.divf %151, %152 : vector<5x64xf32>
    %154 = arith.mulf %146, %153 : vector<5x64xf32>
    %155 = arith.truncf %154 : vector<5x64xf32> to vector<5x64xbf16>
    %c0_52 = arith.constant 0 : index
    %c0_53 = arith.constant 0 : index
    %156 = vector.load %arg12[%c0_52, %c0_53] : memref<64x32xbf16, #tpu.memory_space<vmem>>, vector<64x32xbf16>
    %cst_54 = arith.constant dense<0.000000e+00> : vector<5x32xf32>
    %157 = tpu.matmul %155, %156, %cst_54 {dimension_numbers = #tpu.dot_dimension_numbers<[1], [0], [0], [1], [0, 0, 1, 1], [], []>} : vector<5x64xbf16>, vector<64x32xbf16>, vector<5x32xf32> -> vector<5x32xf32>
    %c0_55 = arith.constant 0 : index
    %c0_56 = arith.constant 0 : index
    %158 = vector.load %arg13[%c0_55, %c0_56] : memref<1x32xf32, #tpu.memory_space<vmem>>, vector<1x32xf32>
    %159 = vector.broadcast %158 : vector<1x32xf32> to vector<5x32xf32>
    %160 = arith.addf %157, %159 : vector<5x32xf32>
    %161 = arith.addf %116, %160 : vector<5x32xf32>
    %162 = vector.extract_strided_slice %161 {offsets = [0, 0], sizes = [1, 32], strides = [1, 1]} : vector<5x32xf32> to vector<1x32xf32>
    %c0_57 = arith.constant 0 : index
    %c0_58 = arith.constant 0 : index
    %163 = vector.load %arg14[%c0_57, %c0_58] : memref<1x32xf32, #tpu.memory_space<vmem>>, vector<1x32xf32>
    %c0_59 = arith.constant 0 : index
    %c0_60 = arith.constant 0 : index
    %164 = vector.load %arg15[%c0_59, %c0_60] : memref<1x32xf32, #tpu.memory_space<vmem>>, vector<1x32xf32>
    %cst_61 = arith.constant dense<0.000000e+00> : vector<1xf32>
    %165 = vector.multi_reduction <add>, %162, %cst_61 [1] : vector<1x32xf32> to vector<1xf32>
    %166 = vector.shape_cast %165 : vector<1xf32> to vector<1x1xf32>
    %cst_62 = arith.constant 3.200000e+01 : f32
    %167 = vector.broadcast %cst_62 : f32 to vector<1x1xf32>
    %168 = arith.divf %166, %167 : vector<1x1xf32>
    %169 = vector.broadcast %168 : vector<1x1xf32> to vector<1x32xf32>
    %170 = arith.subf %162, %169 : vector<1x32xf32>
    %171 = arith.mulf %170, %170 : vector<1x32xf32>
    %cst_63 = arith.constant dense<0.000000e+00> : vector<1xf32>
    %172 = vector.multi_reduction <add>, %171, %cst_63 [1] : vector<1x32xf32> to vector<1xf32>
    %173 = vector.shape_cast %172 : vector<1xf32> to vector<1x1xf32>
    %cst_64 = arith.constant 3.200000e+01 : f32
    %174 = vector.broadcast %cst_64 : f32 to vector<1x1xf32>
    %175 = arith.divf %173, %174 : vector<1x1xf32>
    %176 = vector.broadcast %168 : vector<1x1xf32> to vector<1x32xf32>
    %177 = arith.subf %162, %176 : vector<1x32xf32>
    %cst_65 = arith.constant 9.99999974E-6 : f32
    %178 = vector.broadcast %cst_65 : f32 to vector<1x1xf32>
    %179 = arith.addf %175, %178 : vector<1x1xf32>
    %180 = math.rsqrt %179 : vector<1x1xf32>
    %181 = vector.broadcast %180 : vector<1x1xf32> to vector<1x32xf32>
    %182 = arith.mulf %177, %181 : vector<1x32xf32>
    %183 = arith.mulf %182, %163 : vector<1x32xf32>
    %184 = arith.addf %183, %164 : vector<1x32xf32>
    %185 = arith.truncf %184 : vector<1x32xf32> to vector<1x32xbf16>
    %c0_66 = arith.constant 0 : index
    %c0_67 = arith.constant 0 : index
    %186 = vector.load %arg16[%c0_66, %c0_67] : memref<32x24xbf16, #tpu.memory_space<vmem>>, vector<32x24xbf16>
    %cst_68 = arith.constant dense<0.000000e+00> : vector<1x24xf32>
    %187 = tpu.matmul %185, %186, %cst_68 {dimension_numbers = #tpu.dot_dimension_numbers<[1], [0], [0], [1], [0, 0, 1, 1], [], []>} : vector<1x32xbf16>, vector<32x24xbf16>, vector<1x24xf32> -> vector<1x24xf32>
    %c0_69 = arith.constant 0 : index
    %c0_70 = arith.constant 0 : index
    %c0_71 = arith.constant 0 : index
    %188 = vector.load %arg17[%c0_69, %c0_70, %c0_71] : memref<1x1x24xf32, #tpu.memory_space<vmem>>, vector<1x1x24xf32>
    %189 = vector.shape_cast %188 : vector<1x1x24xf32> to vector<1x24xf32>
    %190 = vector.shape_cast %187 : vector<1x24xf32> to vector<1x1x24xf32>
    tpu.vector_store %arg17[%c0_69, %c0_70, %c0_71], %190 {strides = array<i32>} : memref<1x1x24xf32, #tpu.memory_space<vmem>>, vector<1x1x24xf32>,
    return
  }
  func.func @transform_0(%arg0: i32) -> (i32, i32, i32) {
    %c0_i32 = arith.constant 0 : i32
    %c0_i32_0 = arith.constant 0 : i32
    %c0_i32_1 = arith.constant 0 : i32
    return %arg0, %c0_i32, %c0_i32_0 : i32, i32, i32
  }
  func.func @transform_1(%arg0: i32) -> (i32, i32) {
    %c0_i32 = arith.constant 0 : i32
    %c0_i32_0 = arith.constant 0 : i32
    %c0_i32_1 = arith.constant 0 : i32
    return %c0_i32, %c0_i32_0 : i32, i32
  }
  func.func @transform_2(%arg0: i32) -> (i32, i32) {
    %c0_i32 = arith.constant 0 : i32
    %c0_i32_0 = arith.constant 0 : i32
    %c0_i32_1 = arith.constant 0 : i32
    return %c0_i32, %c0_i32_0 : i32, i32
  }
  func.func @transform_3(%arg0: i32) -> (i32, i32) {
    %c0_i32 = arith.constant 0 : i32
    %c0_i32_0 = arith.constant 0 : i32
    %c0_i32_1 = arith.constant 0 : i32
    return %c0_i32, %c0_i32_0 : i32, i32
  }
  func.func @transform_4(%arg0: i32) -> (i32, i32) {
    %c0_i32 = arith.constant 0 : i32
    %c0_i32_0 = arith.constant 0 : i32
    %c0_i32_1 = arith.constant 0 : i32
    return %c0_i32, %c0_i32_0 : i32, i32
  }
  func.func @transform_5(%arg0: i32) -> (i32, i32) {
    %c0_i32 = arith.constant 0 : i32
    %c0_i32_0 = arith.constant 0 : i32
    %c0_i32_1 = arith.constant 0 : i32
    return %c0_i32, %c0_i32_0 : i32, i32
  }
  func.func @transform_6(%arg0: i32) -> (i32, i32) {
    %c0_i32 = arith.constant 0 : i32
    %c0_i32_0 = arith.constant 0 : i32
    %c0_i32_1 = arith.constant 0 : i32
    return %c0_i32, %c0_i32_0 : i32, i32
  }
  func.func @transform_7(%arg0: i32) -> (i32, i32) {
    %c0_i32 = arith.constant 0 : i32
    %c0_i32_0 = arith.constant 0 : i32
    %c0_i32_1 = arith.constant 0 : i32
    return %c0_i32, %c0_i32_0 : i32, i32
  }
  func.func @transform_8(%arg0: i32) -> (i32, i32) {
    %c0_i32 = arith.constant 0 : i32
    %c0_i32_0 = arith.constant 0 : i32
    %c0_i32_1 = arith.constant 0 : i32
    return %c0_i32, %c0_i32_0 : i32, i32
  }
  func.func @transform_9(%arg0: i32) -> (i32, i32) {
    %c0_i32 = arith.constant 0 : i32
    %c0_i32_0 = arith.constant 0 : i32
    %c0_i32_1 = arith.constant 0 : i32
    return %c0_i32, %c0_i32_0 : i32, i32
  }
  func.func @transform_10(%arg0: i32) -> (i32, i32) {
    %c0_i32 = arith.constant 0 : i32
    %c0_i32_0 = arith.constant 0 : i32
    %c0_i32_1 = arith.constant 0 : i32
    return %c0_i32, %c0_i32_0 : i32, i32
  }
  func.func @transform_11(%arg0: i32) -> (i32, i32) {
    %c0_i32 = arith.constant 0 : i32
    %c0_i32_0 = arith.constant 0 : i32
    %c0_i32_1 = arith.constant 0 : i32
    return %c0_i32, %c0_i32_0 : i32, i32
  }
  func.func @transform_12(%arg0: i32) -> (i32, i32) {
    %c0_i32 = arith.constant 0 : i32
    %c0_i32_0 = arith.constant 0 : i32
    %c0_i32_1 = arith.constant 0 : i32
    return %c0_i32, %c0_i32_0 : i32, i32
  }
  func.func @transform_13(%arg0: i32) -> (i32, i32) {
    %c0_i32 = arith.constant 0 : i32
    %c0_i32_0 = arith.constant 0 : i32
    %c0_i32_1 = arith.constant 0 : i32
    return %c0_i32, %c0_i32_0 : i32, i32
  }
  func.func @transform_14(%arg0: i32) -> (i32, i32) {
    %c0_i32 = arith.constant 0 : i32
    %c0_i32_0 = arith.constant 0 : i32
    %c0_i32_1 = arith.constant 0 : i32
    return %c0_i32, %c0_i32_0 : i32, i32
  }
  func.func @transform_15(%arg0: i32) -> (i32, i32) {
    %c0_i32 = arith.constant 0 : i32
    %c0_i32_0 = arith.constant 0 : i32
    %c0_i32_1 = arith.constant 0 : i32
    return %c0_i32, %c0_i32_0 : i32, i32
  }
  func.func @transform_16(%arg0: i32) -> (i32, i32, i32) {
    %c0_i32 = arith.constant 0 : i32
    %c0_i32_0 = arith.constant 0 : i32
    %c0_i32_1 = arith.constant 0 : i32
    return %arg0, %c0_i32, %c0_i32_0 : i32, i32, i32
  }
}

</mosaic_0001>

<bundles_post_ra>
// kernel: clip_vision_wrapper_forward.3
= control target key start
LH: loop header
LB: loop body
LE: loop exit
PB: predicated region body
PF: predicated region fallthrough
CT: control target
= control target key end

     0   :  { %s548_s18 = smov 0   ;;  %s618_s0 = inlined_call_operand.vmem [shape: f32[2,5,192], index: 0, kind: input, shape index: {}]   ;;  %s619_s1 = inlined_call_operand.vmem [shape: bf16[192,32], index: 1, kind: input, shape index: {}]   ;;  %s620_s2 = inlined_call_operand.vmem [shape: f32[5,32], index: 2, kind: input, shape index: {}]   ;;  %s621_s3 = inlined_call_operand.vmem [shape: f32[1,32], index: 3, kind: input, shape index: {}]   ;;  %s622_s4 = inlined_call_operand.vmem [shape: f32[1,32], index: 4, kind: input, shape index: {}]   ;;  %s623_s5 = inlined_call_operand.vmem [shape: bf16[2,5,32], index: 5, kind: output, shape index: {}]  }
   0x1 LB: > { %s460_s19 = sadd.s32 4294967295, %s515_s18   ;;  %p464_p0 = scmp.ge.s32.totalorder %s515_s18, 1  ;;  %s515_s18 = sphi %s548_s18, %s15_s18  }
   0x2   : > { %p187_p1 = scmp.lt.s32.totalorder %s515_s18, 3 }
   0x4   : > { %p188_p2 = pnand %p464_p0, %p187_p1 }
   0x5   : > { %v495_v0 = vld [vmem:[%s619_s1] sm:$0xff] (!%p188_p2)   ;;  %v517_v1 = vmov (!%p188_p2), 0   ;;  %p214_p3 = scmp.lt.s32.totalorder (!%p188_p2), %s460_s19, 1  ;;  %v496_v2 = vld [vmem:[%s619_s1 + $0x8] sm:$0xff] (!%p188_p2)   ;;  %v497_v3 = vld [vmem:[%s619_s1 + $0x10] sm:$0xff] (!%p188_p2)   ;;  %vm325_vm0 = vcmask (!%p188_p2), 523264  }
   0x6   : > { %191 = sbr.rel (%p188_p2) target bundleno = 585 (0x249), region = 40  ;;  %329 = vmatprep.subr.bf16.mxu0 (!%p188_p2), %v517_v1  ;;  %v498_v4 = vld [vmem:[%s619_s1 + $0x18] sm:$0xff] (!%p188_p2)   ;;  %v499_v7 = vld [vmem:[%s619_s1 + $0x20] sm:$0xff] (!%p188_p2)   ;;  %v500_v8 = vld [vmem:[%s619_s1 + $0x28] sm:$0xff] (!%p188_p2)   ;;  %vm371_vm1 = vcmask (!%p188_p2), 258048   ;;  %vm401_vm2 = vcmask (!%p188_p2), 256000  }
   0x7   : > { %330 = vmatpush1.bf16.msra.mxu0 (!%p188_p2), %v495_v0  ;;  %v501_v9 = vld [vmem:[%s619_s1 + $0x30] sm:$0xff] (!%p188_p2)   ;;  %v502_v10 = vld [vmem:[%s619_s1 + $0x38] sm:$0xff] (!%p188_p2)   ;;  %v503_v11 = vld [vmem:[%s619_s1 + $0x40] sm:$0xff] (!%p188_p2)   ;;  %vm402_vm3 = vsmask.f32 (!%p188_p2), 2304 }
   0x8   : > { %331 = vmatprep.subr.bf16.mxu0 (!%p188_p2), %v517_v1  ;;  %v504_v12 = vld [vmem:[%s619_s1 + $0x48] sm:$0xff] (!%p188_p2)   ;;  %v505_v13 = vld [vmem:[%s619_s1 + $0x50] sm:$0xff] (!%p188_p2)   ;;  %v506_v14 = vld [vmem:[%s619_s1 + $0x58] sm:$0xff] (!%p188_p2)  }
   0x9   : > { %v252_v17 = vld [vmem:[%s620_s2] sm:$0x1f] (!%p188_p2)  ;;  %vm403_vm4 = vmand (!%p188_p2), %vm401_vm2, %vm402_vm3 }
   0xa   : > { %v481_v33 = vld [vmem:[%s621_s3] ss:$0 sm:$0xff] (!%p188_p2) }
   0xb   : > { %332 = vmatpush1.bf16.msra.mxu0 (!%p188_p2), %v496_v2  ;;  %v482_v35 = vld [vmem:[%s622_s4] ss:$0 sm:$0xff] (!%p188_p2) }
   0xc   : > { %333 = vmatprep.subr.bf16.mxu0 (!%p188_p2), %v517_v1 }
   0xd   : > { %s625_s19 = smov (!%p214_p3, %s460_s19), 1 }
   0xe   : > { %s485_s26 = sshll.u32 %s625_s19, 4  ;;  %s467_s27 = sshll.u32 %s625_s19, 2 }
   0xf   : > { %s571_s29 = scalar_lea.vmem %s618_s0, %s485_s26  ;;  %334 = vmatpush1.bf16.msra.mxu0 %v497_v3  ;;  %s222_s9 = scalar_lea.vmem %s623_s5, %s467_s27 }
  0x10   : > { %335 = vmatprep.subr.bf16.mxu0 %v517_v1  ;;  %v225_v5 = vld [vmem:[%s571_s29 + $0x8] sm:$0x1f]  ;;  %v224_v15 = vld [vmem:[%s571_s29] sm:$0x1f] }
  0x11   : > { %v227_v6 = vpack.c.bf16 %v225_v5, %v225_v5  ;;  %v226_v16 = vpack.c.bf16 %v224_v15, %v224_v15  ;;  %v404_v38 = vld [vmem:[%s222_s9] sm:$0x7] }
  0x13   : > { %336 = vmatpush1.bf16.msra.mxu0 %v498_v4  ;;  %480 = vmatprep.mubr.msk.bf16.mxu0 %vm325_vm0, %v227_v6 }
  0x14   : > { %337 = vmatprep.subr.bf16.mxu0 %v517_v1 }
  0x17   : > { %338 = vmatpush1.bf16.msra.mxu0 %v499_v7 }
  0x18   : > { %339 = vmatprep.subr.bf16.mxu0 %v517_v1 }
  0x1b   : > { %340 = vmatpush1.bf16.msra.mxu0 %v500_v8 }
  0x1c   : > { %341 = vmatprep.subr.bf16.mxu0 %v517_v1 }
  0x1f   : > { %342 = vmatpush1.bf16.msra.mxu0 %v501_v9 }
  0x20   : > { %343 = vmatprep.subr.bf16.mxu0 %v517_v1 }
  0x23   : > { %344 = vmatpush1.bf16.msra.mxu0 %v502_v10 }
  0x24   : > { %345 = vmatprep.subr.bf16.mxu0 %v517_v1 }
  0x27   : > { %346 = vmatpush1.bf16.msra.mxu0 %v503_v11 }
  0x28   : > { %347 = vmatprep.subr.bf16.mxu0 %v517_v1 }
  0x2b   : > { %348 = vmatpush1.bf16.msra.mxu0 %v504_v12 }
  0x2c   : > { %349 = vmatprep.subr.bf16.mxu0 %v517_v1 }
  0x2f   : > { %350 = vmatpush1.bf16.msra.mxu0 %v505_v13 }
  0x30   : > { %351 = vmatprep.subr.bf16.mxu0 %v517_v1 }
  0x33   : > { %352 = vmatpush1.bf16.msra.mxu0 %v506_v14 }
  0x36   : > { %362 = vmatmul.mubr.bf16.vlgmr.msra.gmra.mrb[0].mxu0 %v226_v16 }
 0x109   : > { %v363_v18 = vpop.f32.mrb[0].mxu0 }
 0x10a   : > { %v364_v19 = vadd.f32 %v363_v18, %v252_v17  ;;  %v365_v20 = vpop.f32.mrb[1].mxu0 }
 0x10b   : > { %v366_v21 = vpop.f32.mrb[2].mxu0 }
 0x10c   : > { %v367_v22 = vpop.f32.mrb[3].mxu0  ;;  %v372_v23 = vsel %vm371_vm1, %v364_v19, 0.0 }
 0x10d   : > { %373 = vadd.xlane.f32.xlu0 %v372_v23 }
 0x19a   : > { %v374_v24 = vpop.xlane.xlu0 %373 }
 0x19b   : > { %v376_v25 = vmul.f32 0.03125, %v374_v24 }
 0x19d   : > { %v377_v26 = vsub.f32 %v364_v19, %v376_v25 }
 0x19f   : > { %v378_v27 = vmul.f32 %v377_v26, %v377_v26 }
 0x1a1   : > { %v379_v28 = vsel %vm371_vm1, %v378_v27, 0.0 }
 0x1a2   : > { %380 = vadd.xlane.f32.xlu0 %v379_v28 }
 0x22f   : > { %v381_v29 = vpop.xlane.xlu0 %380 }
 0x230   : > { %v382_v30 = vmul.f32 0.03125, %v381_v29 }
 0x232   : > { %v383_v31 = vadd.f32 1e-05, %v382_v30 }
 0x234   : > { %507 = vrsqrt.f32 %v383_v31 }
 0x23e   : > { %v508_v32 = vpop.eup %507 }
 0x23f   : > { %v385_v34 = vmul.f32 %v508_v32, %v377_v26 }
 0x241   : > { %v392_v36 = vmul.f32 %v481_v33, %v385_v34 }
 0x243   : > { %v399_v37 = vadd.f32 %v482_v35, %v392_v36 }
 0x245   : > { %v400_v39 = vpack.c.bf16 %v399_v37, %v399_v37 }
 0x247   : > { %v405_v40 = vsel %vm403_vm4, %v400_v39, %v404_v38 }
 0x248   : > { %406 = vst [vmem:[%s222_s9] sm:$0x7] %v405_v40 }
 0x249 PF: > { %s15_s18 = sadd.s32 1, %s515_s18  }
 0x24a   : > { %p12_p4 = scmp.ge.s32.totalorder %s15_s18, 4  }
 0x24c   :  { %14 = sbr.rel (!%p12_p4) target bundleno = 1 (0x1), region = 70 }

// kernel: clip_vision_wrapper_forward.4
= control target key start
LH: loop header
LB: loop body
LE: loop exit
PB: predicated region body
PF: predicated region fallthrough
CT: control target
= control target key end

     0   :  { %s1627_s25 = smov 0   ;;  %s1799_s0 = inlined_call_operand.vmem [shape: bf16[2,5,32], index: 0, kind: input, shape index: {}]   ;;  %s1800_s1 = inlined_call_operand.vmem [shape: f32[1,32], index: 1, kind: input, shape index: {}]   ;;  %s1801_s2 = inlined_call_operand.vmem [shape: f32[1,32], index: 2, kind: input, shape index: {}]   ;;  %s1802_s3 = inlined_call_operand.vmem [shape: bf16[32,96], index: 3, kind: input, shape index: {}]   ;;  %s1803_s4 = inlined_call_operand.vmem [shape: f32[1,96], index: 4, kind: input, shape index: {}]   ;;  %s1804_s5 = inlined_call_operand.vmem [shape: bf16[32,32], index: 5, kind: input, shape index: {}]   ;;  %s1805_s6 = inlined_call_operand.vmem [shape: f32[1,32], index: 6, kind: input, shape index: {}]   ;;  %s1806_s7 = inlined_call_operand.vmem [shape: f32[1,32], index: 7, kind: input, shape index: {}]   ;;  %s1807_s8 = inlined_call_operand.vmem [shape: f32[1,32], index: 8, kind: input, shape index: {}]   ;;  %s1808_s9 = inlined_call_operand.vmem [shape: bf16[32,64], index: 9, kind: input, shape index: {}]   ;;  %s1809_s10 = inlined_call_operand.vmem [shape: f32[1,64], index: 10, kind: input, shape index: {}]   ;;  %s1810_s11 = inlined_call_operand.vmem [shape: bf16[64,32], index: 11, kind: input, shape index: {}]   ;;  %s1811_s12 = inlined_call_operand.vmem [shape: f32[1,32], index: 12, kind: input, shape index: {}]   ;;  %s1812_s13 = inlined_call_operand.vmem [shape: bf16[2,5,32], index: 13, kind: output, shape index: {}]  }
   0x1 LB: > { %s1319_s26 = sadd.s32 4294967295, %s1538_s25   ;;  %p1323_p0 = scmp.ge.s32.totalorder %s1538_s25, 1  ;;  %s1538_s25 = sphi %s1627_s25, %s23_s25  }
   0x2   : > { %p386_p1 = scmp.lt.s32.totalorder %s1538_s25, 3 }
   0x4   : > { %p387_p2 = pnand %p1323_p0, %p386_p1 }
   0x5   : > { %p428_p3 = scmp.lt.s32.totalorder (!%p387_p2), %s1319_s26, 1  ;;  %vm441_vm0 = vcmask (!%p387_p2), 258048   ;;  %v1498_v8 = vld [vmem:[%s1802_s3] sm:$0xff] (!%p387_p2)   ;;  %v1540_v9 = vmov (!%p387_p2), 0.0   ;;  %vm1541_vm1 = vmmov (!%p387_p2), 0   ;;  %v1499_v10 = vld [vmem:[%s1802_s3 + $0x8] sm:$0xff] (!%p387_p2)  }
   0x6   : > { %390 = sbr.rel (%p387_p2) target bundleno = 2589 (0xa1d), region = 72  ;;  %1389 = vmatprep.subr.bf16.mxu0 (!%p387_p2), %v1540_v9  ;;  %1393 = vmatprep.mubr.msk.bf16.mxu0 (!%p387_p2), %vm1541_vm1, %v1540_v9  ;;  %v1326_v15 = vld [vmem:[%s1800_s1] ss:$0 sm:$0xff] (!%p387_p2)  ;;  %vm494_vm2 = vcmask (!%p387_p2), 261120   ;;  %s1542_s24 = smov (!%p387_p2), 120   ;;  %vm542_vm3 = vcmask (!%p387_p2), 64512  }
   0x7   : > { %1390 = vmatpush3.bf16.msra.mxu0 (!%p387_p2), %v1498_v8  ;;  %1397 = vmatprep.subr.bf16.mxu1 (!%p387_p2), %v1540_v9  ;;  %v1327_v17 = vld [vmem:[%s1801_s2] ss:$0 sm:$0xff] (!%p387_p2)  ;;  %s1543_s28 = smov (!%p387_p2), 96   ;;  %s1544_s29 = smov (!%p387_p2), 88   ;;  %vm589_vm4 = vcmask (!%p387_p2), 36864   ;;  %vm608_vm5 = vcmask (!%p387_p2), 1041408  }
   0x8   : > { %1391 = vmatprep.subr.bf16.mxu0 (!%p387_p2), %v1540_v9  ;;  %1399 = vmatprep.mubr.msk.bf16.mxu1 (!%p387_p2), %vm1541_vm1, %v1540_v9  ;;  %v1328_v21 = vld [vmem:[%s1803_s4] ss:$0 sm:$0xff] (!%p387_p2)  ;;  %s1546_s14 = smov (!%p387_p2), 112   ;;  %s1547_s15 = smov (!%p387_p2), 72   ;;  %vm609_vm6 = vcmask (!%p387_p2), 1042432   ;;  %vm604_vm7 = vcmask (!%p387_p2), 39936  }
   0x9   : > { %s1548_s16 = smov (!%p387_p2), 104   ;;  %s1549_s17 = smov (!%p387_p2), 56   ;;  %vm998_vm8 = vcmask (!%p387_p2), 130048   ;;  %vm1000_vm9 = vcmask (!%p387_p2), 195584   ;;  %vm1214_vm10 = vcmask (!%p387_p2), 523264   ;;  %vm1260_vm11 = vcmask (!%p387_p2), 256000  }
   0xa   : > { %s1550_s18 = smov (!%p387_p2), 64   ;;  %s1551_s19 = smov (!%p387_p2), 48   ;;  %vm1261_vm12 = vsmask.f32 (!%p387_p2), 2304 }
   0xb   : > { %1392 = vmatpush3.bf16.msra.mxu0 (!%p387_p2), %v1499_v10  ;;  %s1552_s20 = smov (!%p387_p2), 40   ;;  %s1554_s21 = smov (!%p387_p2), 8   ;;  %vm1262_vm13 = vmand (!%p387_p2), %vm1260_vm11, %vm1261_vm12 }
   0xc   : > { %1403 = vmatprep.subr.bf16.mxu0 (!%p387_p2), %v1540_v9 }
   0xd   : > { %s1814_s26 = smov (!%p428_p3, %s1319_s26), 1 }
   0xe   : > { %s1324_s27 = sshll.u32 %s1814_s26, 2 }
   0xf   : > { %s431_s30 = scalar_lea.vmem %s1799_s0, %s1324_s27 }
  0x10   : > { %v437_v0 = vld [vmem:[%s431_s30] sm:$0x7]  ;;  %s1545_s30 = smov 80  }
  0x11   : > { %v1643_v1 = vunpack.c.l.bf16 %v437_v0 }
  0x13   : > { %v442_v2 = vsel %vm441_vm0, %v1643_v1, 0.0 }
  0x14   : > { %443 = vadd.xlane.f32.xlu0 %v442_v2 }
  0xa1   : > { %v444_v3 = vpop.xlane.xlu0 %443 }
  0xa2   : > { %v446_v4 = vmul.f32 0.03125, %v444_v3 }
  0xa4   : > { %v447_v5 = vsub.f32 %v1643_v1, %v446_v4 }
  0xa6   : > { %v448_v6 = vmul.f32 %v447_v5, %v447_v5 }
  0xa8   : > { %v449_v7 = vsel %vm441_vm0, %v448_v6, 0.0 }
  0xa9   : > { %450 = vadd.xlane.f32.xlu0 %v449_v7 }
 0x136   : > { %v451_v11 = vpop.xlane.xlu0 %450 }
 0x137   : > { %v452_v12 = vmul.f32 0.03125, %v451_v11 }
 0x139   : > { %v453_v13 = vadd.f32 1e-05, %v452_v12 }
 0x13b   : > { %1508 = vrsqrt.f32 %v453_v13 }
 0x145   : > { %v1509_v14 = vpop.eup %1508 }
 0x146   : > { %v455_v16 = vmul.f32 %v1509_v14, %v447_v5 }
 0x148   : > { %v462_v18 = vmul.f32 %v1326_v15, %v455_v16 }
 0x14a   : > { %v469_v19 = vadd.f32 %v1327_v17, %v462_v18 }
 0x14c   : > { %v470_v20 = vpack.c.bf16 %v469_v19, %v469_v19  ;;  %v1553_v19 = vmov 65535  }
 0x14e   : > { %1394 = vmatmul.mubr.msk.bf16.vlgmr.msra.gmra.mrb[0].mxu0 %vm494_vm2, %v470_v20  ;;  %v610_v20 = vsel %vm608_vm5, 4294967295, %v1553_v19 }
 0x14f   : > { %1405 = vmatprep.mubr.msk.bf16.mxu0 %vm1541_vm1, %v1540_v9 }
 0x221   : > { %v532_v22 = vpop.f32.mrb[0].mxu0 }
 0x222   : > { %v533_v23 = vadd.f32 %v1328_v21, %v532_v22  ;;  %v1395_v24 = vpop.f32.mrb[1].mxu0 }
 0x223   : > { %v535_v25 = vpop.f32.mrb[2].mxu0 }
 0x224   : > { %v1675_v26 = vpack.c.bf16 %v533_v23, %v533_v23  ;;  %v1396_v27 = vpop.f32.mrb[3].mxu0  ;;  %v611_v23 = vsel %vm609_vm6, %v610_v20, 0  ;;  %v1502_v20 = vld [vmem:[%s1808_s9] sm:$0xff]  }
 0x226   : > { %655 = vrot.lane.b32.xlu0 %v1675_v26, %s1542_s24  ;;  %540 = vrot.lane.b32.xlu1 %v1675_v26, %s1543_s28  ;;  %s435_s24 = scalar_lea.vmem %s1812_s13, %s1324_s27 }
 0x22a   : > { %657 = vrot.lane.b32.xlu1 %v1675_v26, %s1544_s29  ;;  %s1555_s29 = smov 16  }
 0x22e   : > { %767 = vrot.lane.b32.xlu1 %v1675_v26, %s1545_s30  ;;  %s1556_s30 = smov 24  }
 0x232   : > { %765 = vrot.lane.b32.xlu1 %v1675_v26, %s1546_s14 }
 0x236   : > { %877 = vrot.lane.b32.xlu1 %v1675_v26, %s1547_s15 }
 0x23a   : > { %875 = vrot.lane.b32.xlu1 %v1675_v26, %s1548_s16 }
 0x298   : > { %v541_v28 = vpop.permute.xlu1 %540  ;;  %v656_v33 = vpop.permute.xlu0 %655 }
 0x299   : > { %v547_v29 = vsel %vm542_vm3, %v541_v28, 0 }
 0x29a   : > { %1398 = vmatpush3.bf16.xpose.msra.mxu1 %v547_v29 }
 0x29b   : > { %1409 = vmatprep.subr.bf16.mxu1 %v1540_v9 }
 0x29c   : > { %v658_v30 = vpop.permute.xlu1 %657 }
 0x29d   : > { %v663_v31 = vsel %vm542_vm3, %v658_v30, 0 }
 0x2a0   : > { %v768_v32 = vpop.permute.xlu1 %767 }
 0x2a1   : > { %1400 = vmatmul.mubr.msk.bf16.vlgmr.msra.gmra.mrb[0].mxu1 %vm542_vm3, %v1675_v26  ;;  %v773_v35 = vsel %vm542_vm3, %v768_v32, 0 }
 0x2a2   : > { %1410 = vmatpush3.bf16.xpose.msra.mxu1 %v663_v31  ;;  %1411 = vmatprep.mubr.msk.bf16.mxu1 %vm1541_vm1, %v1540_v9 }
 0x2a3   : > { %1421 = vmatprep.subr.bf16.mxu1 %v1540_v9 }
 0x2a4   : > { %v766_v34 = vpop.permute.xlu1 %765 }
 0x2a8   : > { %v878_v36 = vpop.permute.xlu1 %877 }
 0x2a9   : > { %1412 = vmatmul.mubr.msk.bf16.vlgmr.msra.gmra.mrb[4].mxu1 %vm542_vm3, %v656_v33  ;;  %v883_v37 = vsel %vm542_vm3, %v878_v36, 0 }
 0x2aa   : > { %1422 = vmatpush3.bf16.xpose.msra.mxu1 %v773_v35  ;;  %1423 = vmatprep.mubr.msk.bf16.mxu1 %vm1541_vm1, %v1540_v9 }
 0x2ab   : > { %1433 = vmatprep.subr.bf16.mxu1 %v1540_v9 }
 0x2ac   : > { %v876_v38 = vpop.permute.xlu1 %875 }
 0x2b1   : > { %1424 = vmatmul.mubr.msk.bf16.vlgmr.msra.gmra.mrb[8].mxu1 %vm542_vm3, %v766_v34 }
 0x2b2   : > { %1434 = vmatpush3.bf16.xpose.msra.mxu1 %v883_v37  ;;  %1435 = vmatprep.mubr.msk.bf16.mxu1 %vm1541_vm1, %v1540_v9 }
 0x2b3   : > { %1445 = vmatprep.subr.bf16.mxu1 %v1540_v9 }
 0x2b9   : > { %1436 = vmatmul.mubr.msk.bf16.vlgmr.msra.gmra.mrb[12].mxu1 %vm542_vm3, %v876_v38 }
 0x2ba   : > { %1449 = vmatprep.mubr.msk.bf16.mxu1 %vm1541_vm1, %v1540_v9 }
 0x374   : > { %v583_v39 = vpop.f32.mrb[0].mxu1 }
 0x375   : > { %v1401_v40 = vpop.f32.mrb[1].mxu1  ;;  %v590_v41 = vsel %vm589_vm4, %v583_v39, -inf }
 0x376   : > { %591 = vmax.xlane.f32.xlu1 %v590_v41  ;;  %v586_v42 = vpop.f32.mrb[2].mxu1 }
 0x377   : > { %v1402_v43 = vpop.f32.mrb[3].mxu1 }
 0x37c   : > { %v699_v44 = vpop.f32.mrb[4].mxu1 }
 0x37d   : > { %v1413_v45 = vpop.f32.mrb[5].mxu1  ;;  %v705_v46 = vsel %vm589_vm4, %v699_v44, -inf }
 0x37e   : > { %706 = vmax.xlane.f32.xlu0 %v705_v46  ;;  %v702_v47 = vpop.f32.mrb[6].mxu1 }
 0x37f   : > { %v1414_v48 = vpop.f32.mrb[7].mxu1 }
 0x384   : > { %v809_v49 = vpop.f32.mrb[8].mxu1 }
 0x385   : > { %v1425_v50 = vpop.f32.mrb[9].mxu1  ;;  %v815_v51 = vsel %vm589_vm4, %v809_v49, -inf }
 0x386   : > { %816 = vmax.xlane.f32.xlu1 %v815_v51  ;;  %v812_v52 = vpop.f32.mrb[10].mxu1 }
 0x387   : > { %v1426_v53 = vpop.f32.mrb[11].mxu1  ;;  %v1500_v52 = vld [vmem:[%s1804_s5] sm:$0xff]  }
 0x388   : > { %1446 = vmatpush3.bf16.msra.mxu1 %v1500_v52  ;;  %v1501_v53 = vld [vmem:[%s1804_s5 + $0x8] sm:$0xff]  }
 0x389   : > { %1447 = vmatprep.subr.bf16.mxu1 %v1540_v9 }
 0x38c   : > { %v919_v54 = vpop.f32.mrb[12].mxu1  ;;  %1448 = vmatpush3.bf16.msra.mxu1 %v1501_v53 }
 0x38d   : > { %v1437_v55 = vpop.f32.mrb[13].mxu1  ;;  %v925_v56 = vsel %vm589_vm4, %v919_v54, -inf  ;;  %1461 = vmatprep.subr.bf16.mxu1 %v1540_v9 }
 0x38e   : > { %926 = vmax.xlane.f32.xlu0 %v925_v56  ;;  %v922_v57 = vpop.f32.mrb[14].mxu1 }
 0x38f   : > { %v1438_v58 = vpop.f32.mrb[15].mxu1 }
 0x403   : > { %v592_v59 = vpop.xlane.xlu1 %591 }
 0x404   : > { %v593_v60 = vsub.f32 %v583_v39, %v592_v59 }
 0x406   : > { %v594_v61 = vmul.f32 1.442695, %v593_v60 }
 0x408   : > { %1510 = vpow2.f32 %v594_v61 }
 0x40b   : > { %v707_v62 = vpop.xlane.xlu0 %706 }
 0x40c   : > { %v708_v63 = vsub.f32 %v699_v44, %v707_v62 }
 0x40e   : > { %v709_v0 = vmul.f32 1.442695, %v708_v63 }
 0x410   : > { %1512 = vpow2.f32 %v709_v0 }
 0x412   : > { %v1511_v2 = vpop.eup %1510 }
 0x413   : > { %v596_v3 = vsel %vm589_vm4, %v1511_v2, 0.0  ;;  %v817_v6 = vpop.xlane.xlu1 %816 }
 0x414   : > { %597 = vadd.xlane.f32.xlu1 %v596_v3  ;;  %v818_v7 = vsub.f32 %v809_v49, %v817_v6  ;;  %v1340_v6 = vld [vmem:[%s1805_s6] ss:$0 sm:$0xff] }
 0x416   : > { %v819_v10 = vmul.f32 1.442695, %v818_v7 }
 0x418   : > { %1514 = vpow2.f32 %v819_v10 }
 0x41a   : > { %v1513_v4 = vpop.eup %1512 }
 0x41b   : > { %v711_v5 = vsel %vm589_vm4, %v1513_v4, 0.0  ;;  %v927_v8 = vpop.xlane.xlu0 %926 }
 0x41c   : > { %712 = vadd.xlane.f32.xlu0 %v711_v5  ;;  %v928_v11 = vsub.f32 %v919_v54, %v927_v8 }
 0x41e   : > { %v929_v12 = vmul.f32 1.442695, %v928_v11 }
 0x420   : > { %1516 = vpow2.f32 %v929_v12 }
 0x422   : > { %v1515_v13 = vpop.eup %1514 }
 0x423   : > { %v821_v14 = vsel %vm589_vm4, %v1515_v13, 0.0 }
 0x425   : > { %717 = vrot.lane.b32.xlu1 %v1675_v26, %s1549_s17 }
 0x42a   : > { %v1517_v15 = vpop.eup %1516 }
 0x42b   : > { %v931_v16 = vsel %vm589_vm4, %v1517_v15, 0.0 }
 0x432   : > { %602 = vrot.lane.b32.xlu0 %v1675_v26, %s1550_s18 }
 0x436   : > { %827 = vrot.lane.b32.xlu0 %v1675_v26, %s1551_s19 }
 0x449   : > { %822 = vadd.xlane.f32.xlu1 %v821_v14 }
 0x44d   : > { %932 = vadd.xlane.f32.xlu1 %v931_v16 }
 0x45e   : > { %937 = vrot.lane.b32.xlu1 %v1675_v26, %s1552_s20 }
 0x4a1   : > { %v598_v17 = vpop.xlane.xlu1 %597 }
 0x4a2   : > { %1518 = vrcp.f32 %v598_v17 }
 0x4a5   : > { %v718_v27 = vpop.permute.xlu1 %717 }
 0x4a6   : > { %v723_v26 = vand.u32 %v718_v27, %v611_v23 }
 0x4a9   : > { %v713_v18 = vpop.xlane.xlu0 %712 }
 0x4aa   : > { %1520 = vrcp.f32 %v713_v18 }
 0x4ac   : > { %v1519_v21 = vpop.eup %1518 }
 0x4ad   : > { %v600_v22 = vmul.f32 %v1519_v21, %v1511_v2  ;;  %v603_v24 = vpop.permute.xlu0 %602 }
 0x4ae   : > { %v613_v25 = vand.u32 %v611_v23, %v603_v24 }
 0x4af   : > { %v601_v28 = vpack.c.bf16 %v600_v22, %v600_v22 }
 0x4b0   : > { %1404 = vmatpush3.bf16.msra.mxu0 %v613_v25  ;;  %v1344_v25 = vld [vmem:[%s1806_s7] ss:$0 sm:$0xff] }
 0x4b1   : > { %1415 = vmatprep.subr.bf16.mxu0 %v1540_v9  ;;  %v828_v31 = vpop.permute.xlu0 %827 }
 0x4b2   : > { %v833_v33 = vand.u32 %v828_v31, %v611_v23  ;;  %v1504_v31 = vld [vmem:[%s1810_s11] sm:$0xff]  }
 0x4b3   : > { %1406 = vmatmul.mubr.msk.bf16.vlgmr.msra.gmra.mrb[4].mxu0 %vm604_vm7, %v601_v28  ;;  %v1345_v28 = vld [vmem:[%s1807_s8] ss:$0 sm:$0xff] }
 0x4b4   : > { %v1521_v29 = vpop.eup %1520  ;;  %1416 = vmatpush3.bf16.msra.mxu0 %v723_v26  ;;  %1417 = vmatprep.mubr.msk.bf16.mxu0 %vm1541_vm1, %v1540_v9 }
 0x4b5   : > { %v715_v30 = vmul.f32 %v1521_v29, %v1513_v4  ;;  %1427 = vmatprep.subr.bf16.mxu0 %v1540_v9 }
 0x4b7   : > { %v716_v32 = vpack.c.bf16 %v715_v30, %v715_v30 }
 0x4bb   : > { %1418 = vmatmul.mubr.msk.bf16.vlgmr.msra.gmra.mrb[8].mxu0 %vm604_vm7, %v716_v32  ;;  %v1505_v32 = vld [vmem:[%s1810_s11 + $0x8] sm:$0xff]  }
 0x4bc   : > { %1428 = vmatpush3.bf16.msra.mxu0 %v833_v33  ;;  %1429 = vmatprep.mubr.msk.bf16.mxu0 %vm1541_vm1, %v1540_v9  ;;  %v1506_v33 = vld [vmem:[%s1810_s11 + $0x10] sm:$0xff]  }
 0x4bd   : > { %1439 = vmatprep.subr.bf16.mxu0 %v1540_v9 }
 0x4d6   : > { %v823_v34 = vpop.xlane.xlu1 %822 }
 0x4d7   : > { %1522 = vrcp.f32 %v823_v34  ;;  %v1507_v34 = vld [vmem:[%s1810_s11 + $0x18] sm:$0xff]  }
 0x4da   : > { %v933_v35 = vpop.xlane.xlu1 %932 }
 0x4db   : > { %1524 = vrcp.f32 %v933_v35  ;;  %v1346_v35 = vld [vmem:[%s1809_s10] ss:$0 sm:$0xff] }
 0x4de   : > { %v938_v38 = vpop.permute.xlu1 %937 }
 0x4df   : > { %v943_v41 = vand.u32 %v938_v38, %v611_v23 }
 0x4e1   : > { %v1523_v36 = vpop.eup %1522 }
 0x4e2   : > { %v825_v37 = vmul.f32 %v1523_v36, %v1515_v13 }
 0x4e4   : > { %v826_v39 = vpack.c.bf16 %v825_v37, %v825_v37 }
 0x4e5   : > { %v1525_v40 = vpop.eup %1524 }
 0x4e6   : > { %1430 = vmatmul.mubr.msk.bf16.vlgmr.msra.gmra.mrb[12].mxu0 %vm604_vm7, %v826_v39  ;;  %v935_v42 = vmul.f32 %v1525_v40, %v1517_v15 }
 0x4e7   : > { %1440 = vmatpush3.bf16.msra.mxu0 %v943_v41  ;;  %1441 = vmatprep.mubr.msk.bf16.mxu0 %vm1541_vm1, %v1540_v9 }
 0x4e8   : > { %1453 = vmatprep.subr.bf16.mxu0 %v1540_v9  ;;  %v936_v43 = vpack.c.bf16 %v935_v42, %v935_v42 }
 0x4ee   : > { %1442 = vmatmul.mubr.msk.bf16.vlgmr.msra.gmra.mrb[16].mxu0 %vm604_vm7, %v936_v43 }
 0x4ef   : > { %1457 = vmatprep.mubr.msk.bf16.mxu0 %vm1541_vm1, %v1540_v9  ;;  %1454 = vmatpush3.bf16.msra.mxu0 %v1502_v20 }
 0x4f0   : > { %1455 = vmatprep.subr.bf16.mxu0 %v1540_v9 }
 0x586   : > { %v649_v44 = vpop.f32.mrb[4].mxu0 }
 0x587   : > { %v1407_v45 = vpop.f32.mrb[5].mxu0 }
 0x588   : > { %v652_v46 = vpop.f32.mrb[6].mxu0 }
 0x589   : > { %v1408_v47 = vpop.f32.mrb[7].mxu0 }
 0x58a   : > { %v1351_v47 = vld [vmem:[%s1811_s12] ss:$0 sm:$0xff] }
 0x58e   : > { %v759_v48 = vpop.f32.mrb[8].mxu0 }
 0x58f   : > { %986 = vrot.lane.b32.xlu0 %v759_v48, %s1554_s21  ;;  %v1419_v49 = vpop.f32.mrb[9].mxu0 }
 0x590   : > { %v762_v50 = vpop.f32.mrb[10].mxu0 }
 0x591   : > { %v1420_v51 = vpop.f32.mrb[11].mxu0 }
 0x5b9   : > { %v869_v54 = vpop.f32.mrb[12].mxu0 }
 0x5ba   : > { %990 = vrot.lane.b32.xlu1 %v869_v54, %s1555_s29  ;;  %v1431_v55 = vpop.f32.mrb[13].mxu0  ;;  %v1263_v54 = vld [vmem:[%s435_s24] sm:$0x7] }
 0x5bb   : > { %v872_v56 = vpop.f32.mrb[14].mxu0 }
 0x5bc   : > { %v1432_v57 = vpop.f32.mrb[15].mxu0 }
 0x5c1   : > { %v979_v58 = vpop.f32.mrb[16].mxu0 }
 0x5c2   : > { %994 = vrot.lane.b32.xlu0 %v979_v58, %s1556_s30  ;;  %v1443_v59 = vpop.f32.mrb[17].mxu0 }
 0x5c3   : > { %v982_v60 = vpop.f32.mrb[18].mxu0 }
 0x5c4   : > { %v1444_v61 = vpop.f32.mrb[19].mxu0 }
 0x601   : > { %v987_v62 = vpop.permute.xlu0 %986 }
 0x602   : > { %v997_v0 = vsel %vm542_vm3, %v649_v44, %v987_v62 }
 0x62c   : > { %v991_v63 = vpop.permute.xlu1 %990 }
 0x62d   : > { %v999_v2 = vsel %vm998_vm8, %v997_v0, %v991_v63 }
 0x634   : > { %v995_v3 = vpop.permute.xlu0 %994 }
 0x635   : > { %v1001_v4 = vsel %vm1000_vm9, %v999_v2, %v995_v3 }
 0x636   : > { %v1002_v5 = vpack.c.bf16 %v1001_v4, %v1001_v4 }
 0x638   : > { %1450 = vmatmul.mubr.msk.bf16.vlgmr.msra.gmra.mrb[16].mxu1 %vm494_vm2, %v1002_v5 }
 0x639   : > { %1469 = vmatprep.mubr.msk.bf16.mxu1 %vm1541_vm1, %v1540_v9  ;;  %1462 = vmatpush3.bf16.msra.mxu1 %v1504_v31 }
 0x63a   : > { %1463 = vmatprep.subr.bf16.mxu1 %v1540_v9 }
 0x63d   : > { %1464 = vmatpush3.bf16.msra.mxu1 %v1505_v32 }
 0x63e   : > { %1465 = vmatprep.subr.bf16.mxu1 %v1540_v9 }
 0x641   : > { %1466 = vmatpush3.bf16.msra.mxu1 %v1506_v33 }
 0x642   : > { %1467 = vmatprep.subr.bf16.mxu1 %v1540_v9 }
 0x645   : > { %1468 = vmatpush3.bf16.msra.mxu1 %v1507_v34 }
 0x70b   : > { %v1063_v7 = vpop.f32.mrb[16].mxu1 }
 0x70c   : > { %v1064_v8 = vadd.f32 %v1340_v6, %v1063_v7  ;;  %v1451_v10 = vpop.f32.mrb[17].mxu1 }
 0x70d   : > { %v1066_v11 = vpop.f32.mrb[18].mxu1 }
 0x70e   : > { %v1749_v12 = vadd.f32 %v1064_v8, %v1643_v1  ;;  %v1452_v13 = vpop.f32.mrb[19].mxu1  ;;  %v1503_v1 = vld [vmem:[%s1808_s9 + $0x8] sm:$0xff]  }
 0x70f   : > { %1456 = vmatpush3.bf16.msra.mxu0 %v1503_v1 }
 0x710   : > { %v1072_v14 = vsel %vm441_vm0, %v1749_v12, 0.0 }
 0x711   : > { %1073 = vadd.xlane.f32.xlu1 %v1072_v14 }
 0x79e   : > { %v1074_v15 = vpop.xlane.xlu1 %1073 }
 0x79f   : > { %v1075_v16 = vmul.f32 0.03125, %v1074_v15 }
 0x7a1   : > { %v1076_v17 = vsub.f32 %v1749_v12, %v1075_v16 }
 0x7a3   : > { %v1077_v18 = vmul.f32 %v1076_v17, %v1076_v17 }
 0x7a5   : > { %v1078_v19 = vsel %vm441_vm0, %v1077_v18, 0.0 }
 0x7a6   : > { %1079 = vadd.xlane.f32.xlu0 %v1078_v19 }
 0x833   : > { %v1080_v21 = vpop.xlane.xlu0 %1079 }
 0x834   : > { %v1081_v22 = vmul.f32 0.03125, %v1080_v21 }
 0x836   : > { %v1082_v23 = vadd.f32 1e-05, %v1081_v22 }
 0x838   : > { %1526 = vrsqrt.f32 %v1082_v23 }
 0x842   : > { %v1527_v24 = vpop.eup %1526 }
 0x843   : > { %v1084_v27 = vmul.f32 %v1527_v24, %v1076_v17 }
 0x845   : > { %v1091_v26 = vmul.f32 %v1344_v25, %v1084_v27 }
 0x847   : > { %v1098_v29 = vadd.f32 %v1345_v28, %v1091_v26 }
 0x849   : > { %v1099_v30 = vpack.c.bf16 %v1098_v29, %v1098_v29 }
 0x84b   : > { %1458 = vmatmul.mubr.msk.bf16.vlgmr.msra.gmra.mrb[20].mxu0 %vm494_vm2, %v1099_v30 }
 0x91e   : > { %v1160_v36 = vpop.f32.mrb[20].mxu0 }
 0x91f   : > { %v1161_v37 = vadd.f32 %v1346_v35, %v1160_v36  ;;  %v1459_v38 = vpop.f32.mrb[21].mxu0 }
 0x920   : > { %v1163_v39 = vpop.f32.mrb[22].mxu0 }
 0x921   : > { %v1350_v40 = vmul.f32 -1.702, %v1161_v37  ;;  %v1460_v41 = vpop.f32.mrb[23].mxu0 }
 0x923   : > { %v1168_v42 = vmul.f32 1.442695, %v1350_v40 }
 0x925   : > { %1528 = vpow2.f32 %v1168_v42 }
 0x92f   : > { %v1529_v43 = vpop.eup %1528 }
 0x930   : > { %v1170_v9 = vadd.f32 1.0, %v1529_v43 }
 0x932   : > { %1530 = vrcp.f32 %v1170_v9 }
 0x93c   : > { %v1531_v44 = vpop.eup %1530 }
 0x93d   : > { %v1173_v45 = vmul.f32 %v1531_v44, %v1161_v37 }
 0x93f   : > { %v1174_v46 = vpack.c.bf16 %v1173_v45, %v1173_v45 }
 0x941   : > { %1470 = vmatmul.mubr.msk.bf16.vlgmr.msra.gmra.mrb[20].mxu1 %vm1214_vm10, %v1174_v46 }
 0xa14   : > { %v1252_v48 = vpop.f32.mrb[20].mxu1 }
 0xa15   : > { %v1253_v49 = vadd.f32 %v1351_v47, %v1252_v48  ;;  %v1471_v50 = vpop.f32.mrb[21].mxu1 }
 0xa16   : > { %v1255_v51 = vpop.f32.mrb[22].mxu1 }
 0xa17   : > { %v1258_v52 = vadd.f32 %v1253_v49, %v1749_v12  ;;  %v1472_v53 = vpop.f32.mrb[23].mxu1 }
 0xa19   : > { %v1259_v55 = vpack.c.bf16 %v1258_v52, %v1258_v52 }
 0xa1b   : > { %v1264_v56 = vsel %vm1262_vm13, %v1259_v55, %v1263_v54 }
 0xa1c   : > { %1265 = vst [vmem:[%s435_s24] sm:$0x7] %v1264_v56 }
 0xa1d PF: > { %s23_s25 = sadd.s32 1, %s1538_s25  }
 0xa1e   : > { %p20_p4 = scmp.ge.s32.totalorder %s23_s25, 4  }
 0xa20   :  { %22 = sbr.rel (!%p20_p4) target bundleno = 1 (0x1), region = 102 }

// kernel: clip_vision_wrapper_forward.5
= control target key start
LH: loop header
LB: loop body
LE: loop exit
PB: predicated region body
PF: predicated region fallthrough
CT: control target
= control target key end

     0   :  { %s2180_s0 = inlined_call_operand.vmem [shape: bf16[2,5,32], index: 0, kind: input, shape index: {}]   ;;  %s2181_s1 = inlined_call_operand.vmem [shape: f32[1,32], index: 1, kind: input, shape index: {}]   ;;  %s2182_s2 = inlined_call_operand.vmem [shape: f32[1,32], index: 2, kind: input, shape index: {}]   ;;  %s2183_s3 = inlined_call_operand.vmem [shape: bf16[32,96], index: 3, kind: input, shape index: {}]   ;;  %s2184_s4 = inlined_call_operand.vmem [shape: f32[1,96], index: 4, kind: input, shape index: {}]   ;;  %s2185_s5 = inlined_call_operand.vmem [shape: bf16[32,32], index: 5, kind: input, shape index: {}]   ;;  %s2186_s6 = inlined_call_operand.vmem [shape: f32[1,32], index: 6, kind: input, shape index: {}]   ;;  %s2187_s7 = inlined_call_operand.vmem [shape: f32[1,32], index: 7, kind: input, shape index: {}]   ;;  %s2188_s8 = inlined_call_operand.vmem [shape: f32[1,32], index: 8, kind: input, shape index: {}]   ;;  %s2189_s9 = inlined_call_operand.vmem [shape: bf16[32,64], index: 9, kind: input, shape index: {}]   ;;  %s2190_s10 = inlined_call_operand.vmem [shape: f32[1,64], index: 10, kind: input, shape index: {}]   ;;  %s2191_s11 = inlined_call_operand.vmem [shape: bf16[64,32], index: 11, kind: input, shape index: {}]   ;;  %s2192_s12 = inlined_call_operand.vmem [shape: f32[1,32], index: 12, kind: input, shape index: {}]   ;;  %s2193_s13 = inlined_call_operand.vmem [shape: f32[1,32], index: 13, kind: input, shape index: {}]   ;;  %s2194_s14 = inlined_call_operand.vmem [shape: f32[1,32], index: 14, kind: input, shape index: {}]   ;;  %s2195_s15 = inlined_call_operand.vmem [shape: bf16[32,24], index: 15, kind: input, shape index: {}]   ;;  %s2196_s16 = inlined_call_operand.hbm [shape: f32[2,1,24], index: 16, kind: output, shape index: {}]  }
   0x1   :  { %2197 = sst [smem:[#allocation6_spill]] %s2180_s0 }
   0x2   :  { %2198 = sst [smem:[#allocation7_spill]] %s2181_s1 }
   0x3   :  { %2199 = sst [smem:[#allocation8_spill]] %s2182_s2 }
   0x4   :  { %2200 = sst [smem:[#allocation9_spill]] %s2183_s3 }
   0x5   :  { %21 = vsyncpa [#allocation3], 0 }
   0x6   :  { %23 = vsyncpa [#allocation3 + $0x1], 0  ;;  %s1915_s21 = smov 0   ;;  %s1917_s22 = smov 0  }
   0x7   :  { %s1919_s23 = smov 0   ;;  %s1921_s24 = smov 0  }
   0x8 LB: > { %s1936_s25 = sadd.s32 4294967295, %s1810_s24   ;;  %s1487_s26 = sadd.s32 4294967294, %s1810_s24   ;;  %s1810_s24 = sphi %s1921_s24, %s2212_s24   ;;  %s1806_s23 = sphi %s1919_s23, %s2211_s23   ;;  %s1802_s22 = sphi %s1917_s22, %s2210_s22   ;;  %s1798_s21 = sphi %s1915_s21, %s2209_s21  }
   0x9   : > { %s1940_s27 = sadd.s32 1, %s1810_s24   ;;  %s377_s28 = sadd.s32 1, %s1806_s23 }
   0xa   : > { %s374_s29 = ssub.s32 %s1810_s24, %s1940_s27  ;;  %p387_p0 = scmp.ne.s32.totalorder %s1806_s23, %s1802_s22 }
   0xb   : > { %p375_p1 = scmp.eq.s32.totalorder %s374_s29, 0  ;;  %p388_p2 = scmp.eq.s32.totalorder %s1936_s25, 1 }
   0xc   : > { %p393_p3 = scmp.ne.s32.totalorder %s1802_s22, %s1798_s21  ;;  %p394_p4 = scmp.eq.s32.totalorder %s1487_s26, 1 }
   0xd   : > { %s1951_s30 = scalar_select %p375_p1, %s1806_s23, %s377_s28  }
   0xe   : > { %p1953_p5 = por %p388_p2, %p387_p0  ;;  %p1957_p6 = por %p394_p4, %p393_p3 }
   0xf   : > { %2201 = sst [smem:[#allocation5_spill]] %s1951_s30  ;;  %p1490_p7 = scmp.ge.s32.totalorder %s1810_s24, 1 }
  0x10   : > { %p464_p8 = scmp.lt.s32.totalorder %s1810_s24, 3 }
  0x12   : > { %p465_p9 = pnand %p1490_p7, %p464_p8 }
  0x13   : > { %p512_p10 = scmp.lt.s32.totalorder (!%p465_p9), %s1936_s25, 1  ;;  %vm521_vm0 = vcmask (!%p465_p9), 258048   ;;  %s2204_s28 = sld [smem:[#allocation6_spill]] (!%p465_p9)  ;;  %v1812_v9 = vmov (!%p465_p9), 0.0   ;;  %vm1813_vm1 = vmmov (!%p465_p9), 0   ;;  %vm574_vm2 = vcmask (!%p465_p9), 261120  }
  0x14   : > { %468 = sbr.rel (%p465_p9) target bundleno = 3142 (0xc46), region = 84  ;;  %s2205_s3 = sld [smem:[#allocation9_spill]] (!%p465_p9)  ;;  %1562 = vmatprep.subr.bf16.mxu0 (!%p465_p9), %v1812_v9  ;;  %1566 = vmatprep.mubr.msk.bf16.mxu0 (!%p465_p9), %vm1813_vm1, %v1812_v9  ;;  %v1494_v21 = vld [vmem:[%s2184_s4] ss:$0 sm:$0xff] (!%p465_p9)  ;;  %vm622_vm3 = vcmask (!%p465_p9), 64512   ;;  %vm669_vm4 = vcmask (!%p465_p9), 36864  }
  0x15   : > { %1570 = vmatprep.subr.bf16.mxu1 (!%p465_p9), %v1812_v9  ;;  %1572 = vmatprep.mubr.msk.bf16.mxu1 (!%p465_p9), %vm1813_vm1, %v1812_v9  ;;  %s2206_s1 = sld [smem:[#allocation7_spill]] (!%p465_p9)  ;;  %s2207_s2 = sld [smem:[#allocation8_spill]] (!%p465_p9)  ;;  %vm688_vm5 = vcmask (!%p465_p9), 1041408   ;;  %vm689_vm6 = vcmask (!%p465_p9), 1042432   ;;  %vm684_vm7 = vcmask (!%p465_p9), 39936   ;;  %vm1078_vm8 = vcmask (!%p465_p9), 130048  }
  0x16   : > { %s1814_s20 = smov (!%p465_p9), 120   ;;  %s1815_s30 = smov (!%p465_p9), 96   ;;  %vm1080_vm9 = vcmask (!%p465_p9), 195584   ;;  %vm1294_vm10 = vcmask (!%p465_p9), 523264   ;;  %vm1341_vm11 = vcmask (!%p465_p9), 253952   ;;  %vm1417_vm12 = vcmask (!%p465_p9), 188416  }
  0x17   : > { %s1816_s26 = smov (!%p465_p9), 88  }
  0x1a   : > { %v1710_v8 = vld [vmem:[%s2205_s3] sm:$0xff] (!%p465_p9)   ;;  %v1711_v10 = vld [vmem:[%s2205_s3 + $0x8] sm:$0xff] (!%p465_p9)  }
  0x1b   : > { %s513_s18 = scalar_select %p512_p10, %s1936_s25, 1  ;;  %1563 = vmatpush3.bf16.msra.mxu0 %v1710_v8  ;;  %v1492_v15 = vld [vmem:[%s2206_s1] ss:$0 sm:$0xff] }
  0x1c   : > { %1564 = vmatprep.subr.bf16.mxu0 %v1812_v9  ;;  %v1493_v17 = vld [vmem:[%s2207_s2] ss:$0 sm:$0xff]  ;;  %s510_s1 = sand.u32 1, %s1802_s22  }
  0x1d   : > { %s1491_s19 = sshll.u32 %s513_s18, 2  ;;  %s1819_s18 = smov 72  }
  0x1e   : > { %s515_s29 = scalar_lea.vmem %s2204_s28, %s1491_s19  ;;  %s1817_s28 = smov 80  }
  0x1f   : > { %v517_v0 = vld [vmem:[%s515_s29] sm:$0x7]  ;;  %1565 = vmatpush3.bf16.msra.mxu0 %v1711_v10  ;;  %s1818_s29 = smov 112   ;;  %s1820_s19 = smov 104  }
  0x20   : > { %v1968_v1 = vunpack.c.l.bf16 %v517_v0  ;;  %1576 = vmatprep.subr.bf16.mxu0 %v1812_v9 }
  0x22   : > { %v522_v2 = vsel %vm521_vm0, %v1968_v1, 0.0 }
  0x23   : > { %523 = vadd.xlane.f32.xlu0 %v522_v2 }
  0xb0   : > { %v524_v3 = vpop.xlane.xlu0 %523 }
  0xb1   : > { %v526_v4 = vmul.f32 0.03125, %v524_v3 }
  0xb3   : > { %v527_v5 = vsub.f32 %v1968_v1, %v526_v4 }
  0xb5   : > { %v528_v6 = vmul.f32 %v527_v5, %v527_v5 }
  0xb7   : > { %v529_v7 = vsel %vm521_vm0, %v528_v6, 0.0 }
  0xb8   : > { %530 = vadd.xlane.f32.xlu0 %v529_v7 }
 0x145   : > { %v531_v11 = vpop.xlane.xlu0 %530 }
 0x146   : > { %v532_v12 = vmul.f32 0.03125, %v531_v11 }
 0x148   : > { %v533_v13 = vadd.f32 1e-05, %v532_v12 }
 0x14a   : > { %1722 = vrsqrt.f32 %v533_v13 }
 0x154   : > { %v1723_v14 = vpop.eup %1722 }
 0x155   : > { %v535_v16 = vmul.f32 %v1723_v14, %v527_v5 }
 0x157   : > { %v542_v18 = vmul.f32 %v1492_v15, %v535_v16 }
 0x159   : > { %v549_v19 = vadd.f32 %v1493_v17, %v542_v18 }
 0x15b   : > { %v550_v20 = vpack.c.bf16 %v549_v19, %v549_v19  ;;  %v1825_v19 = vmov 65535  }
 0x15d   : > { %1567 = vmatmul.mubr.msk.bf16.vlgmr.msra.gmra.mrb[0].mxu0 %vm574_vm2, %v550_v20  ;;  %v690_v20 = vsel %vm688_vm5, 4294967295, %v1825_v19 }
 0x15e   : > { %1578 = vmatprep.mubr.msk.bf16.mxu0 %vm1813_vm1, %v1812_v9 }
 0x230   : > { %v612_v22 = vpop.f32.mrb[0].mxu0 }
 0x231   : > { %v613_v23 = vadd.f32 %v1494_v21, %v612_v22  ;;  %v1568_v24 = vpop.f32.mrb[1].mxu0 }
 0x232   : > { %v615_v25 = vpop.f32.mrb[2].mxu0 }
 0x233   : > { %v2000_v26 = vpack.c.bf16 %v613_v23, %v613_v23  ;;  %v1569_v27 = vpop.f32.mrb[3].mxu0  ;;  %v691_v23 = vsel %vm689_vm6, %v690_v20, 0  ;;  %v1714_v20 = vld [vmem:[%s2189_s9] sm:$0xff]  }
 0x235   : > { %735 = vrot.lane.b32.xlu0 %v2000_v26, %s1814_s20  ;;  %620 = vrot.lane.b32.xlu1 %v2000_v26, %s1815_s30  ;;  %s1821_s20 = smov 56   ;;  %s1822_s30 = smov 64  }
 0x239   : > { %737 = vrot.lane.b32.xlu1 %v2000_v26, %s1816_s26  ;;  %s1823_s26 = smov 48  }
 0x23d   : > { %847 = vrot.lane.b32.xlu1 %v2000_v26, %s1817_s28  ;;  %s1824_s28 = smov 40  }
 0x241   : > { %845 = vrot.lane.b32.xlu1 %v2000_v26, %s1818_s29  ;;  %s1826_s29 = smov 8  }
 0x245   : > { %957 = vrot.lane.b32.xlu1 %v2000_v26, %s1819_s18  ;;  %s511_s18 = scalar_lea.vmem [#allocation2], %s510_s1 }
 0x249   : > { %955 = vrot.lane.b32.xlu1 %v2000_v26, %s1820_s19  ;;  %s1432_s19 = sshll.u32 %s511_s18, 4  ;;  %s2140_s19 = int_to_ptr.vmem [resolvable:$true] %s1432_s19 }
 0x2a7   : > { %v621_v28 = vpop.permute.xlu1 %620  ;;  %v736_v33 = vpop.permute.xlu0 %735 }
 0x2a8   : > { %v627_v29 = vsel %vm622_vm3, %v621_v28, 0 }
 0x2a9   : > { %1571 = vmatpush3.bf16.xpose.msra.mxu1 %v627_v29 }
 0x2aa   : > { %1582 = vmatprep.subr.bf16.mxu1 %v1812_v9 }
 0x2ab   : > { %v738_v30 = vpop.permute.xlu1 %737 }
 0x2ac   : > { %v743_v31 = vsel %vm622_vm3, %v738_v30, 0 }
 0x2af   : > { %v848_v32 = vpop.permute.xlu1 %847 }
 0x2b0   : > { %1573 = vmatmul.mubr.msk.bf16.vlgmr.msra.gmra.mrb[0].mxu1 %vm622_vm3, %v2000_v26  ;;  %v853_v35 = vsel %vm622_vm3, %v848_v32, 0 }
 0x2b1   : > { %1583 = vmatpush3.bf16.xpose.msra.mxu1 %v743_v31  ;;  %1584 = vmatprep.mubr.msk.bf16.mxu1 %vm1813_vm1, %v1812_v9 }
 0x2b2   : > { %1594 = vmatprep.subr.bf16.mxu1 %v1812_v9 }
 0x2b3   : > { %v846_v34 = vpop.permute.xlu1 %845 }
 0x2b7   : > { %v958_v36 = vpop.permute.xlu1 %957 }
 0x2b8   : > { %1585 = vmatmul.mubr.msk.bf16.vlgmr.msra.gmra.mrb[4].mxu1 %vm622_vm3, %v736_v33  ;;  %v963_v37 = vsel %vm622_vm3, %v958_v36, 0 }
 0x2b9   : > { %1595 = vmatpush3.bf16.xpose.msra.mxu1 %v853_v35  ;;  %1596 = vmatprep.mubr.msk.bf16.mxu1 %vm1813_vm1, %v1812_v9 }
 0x2ba   : > { %1606 = vmatprep.subr.bf16.mxu1 %v1812_v9 }
 0x2bb   : > { %v956_v38 = vpop.permute.xlu1 %955 }
 0x2c0   : > { %1597 = vmatmul.mubr.msk.bf16.vlgmr.msra.gmra.mrb[8].mxu1 %vm622_vm3, %v846_v34 }
 0x2c1   : > { %1607 = vmatpush3.bf16.xpose.msra.mxu1 %v963_v37  ;;  %1608 = vmatprep.mubr.msk.bf16.mxu1 %vm1813_vm1, %v1812_v9 }
 0x2c2   : > { %1618 = vmatprep.subr.bf16.mxu1 %v1812_v9 }
 0x2c8   : > { %1609 = vmatmul.mubr.msk.bf16.vlgmr.msra.gmra.mrb[12].mxu1 %vm622_vm3, %v956_v38 }
 0x2c9   : > { %1622 = vmatprep.mubr.msk.bf16.mxu1 %vm1813_vm1, %v1812_v9 }
 0x383   : > { %v663_v39 = vpop.f32.mrb[0].mxu1 }
 0x384   : > { %v1574_v40 = vpop.f32.mrb[1].mxu1  ;;  %v670_v41 = vsel %vm669_vm4, %v663_v39, -inf }
 0x385   : > { %671 = vmax.xlane.f32.xlu1 %v670_v41  ;;  %v666_v42 = vpop.f32.mrb[2].mxu1 }
 0x386   : > { %v1575_v43 = vpop.f32.mrb[3].mxu1 }
 0x38b   : > { %v779_v44 = vpop.f32.mrb[4].mxu1 }
 0x38c   : > { %v1586_v45 = vpop.f32.mrb[5].mxu1  ;;  %v785_v46 = vsel %vm669_vm4, %v779_v44, -inf }
 0x38d   : > { %786 = vmax.xlane.f32.xlu0 %v785_v46  ;;  %v782_v47 = vpop.f32.mrb[6].mxu1 }
 0x38e   : > { %v1587_v48 = vpop.f32.mrb[7].mxu1 }
 0x393   : > { %v889_v49 = vpop.f32.mrb[8].mxu1 }
 0x394   : > { %v1598_v50 = vpop.f32.mrb[9].mxu1  ;;  %v895_v51 = vsel %vm669_vm4, %v889_v49, -inf }
 0x395   : > { %896 = vmax.xlane.f32.xlu1 %v895_v51  ;;  %v892_v52 = vpop.f32.mrb[10].mxu1 }
 0x396   : > { %v1599_v53 = vpop.f32.mrb[11].mxu1  ;;  %v1712_v52 = vld [vmem:[%s2185_s5] sm:$0xff]  }
 0x397   : > { %1619 = vmatpush3.bf16.msra.mxu1 %v1712_v52  ;;  %v1713_v53 = vld [vmem:[%s2185_s5 + $0x8] sm:$0xff]  }
 0x398   : > { %1620 = vmatprep.subr.bf16.mxu1 %v1812_v9 }
 0x39b   : > { %v999_v54 = vpop.f32.mrb[12].mxu1  ;;  %1621 = vmatpush3.bf16.msra.mxu1 %v1713_v53 }
 0x39c   : > { %v1610_v55 = vpop.f32.mrb[13].mxu1  ;;  %v1005_v56 = vsel %vm669_vm4, %v999_v54, -inf  ;;  %1634 = vmatprep.subr.bf16.mxu1 %v1812_v9 }
 0x39d   : > { %1006 = vmax.xlane.f32.xlu0 %v1005_v56  ;;  %v1002_v57 = vpop.f32.mrb[14].mxu1 }
 0x39e   : > { %v1611_v58 = vpop.f32.mrb[15].mxu1 }
 0x412   : > { %v672_v59 = vpop.xlane.xlu1 %671 }
 0x413   : > { %v673_v60 = vsub.f32 %v663_v39, %v672_v59 }
 0x415   : > { %v674_v61 = vmul.f32 1.442695, %v673_v60 }
 0x417   : > { %1724 = vpow2.f32 %v674_v61 }
 0x41a   : > { %v787_v62 = vpop.xlane.xlu0 %786 }
 0x41b   : > { %v788_v63 = vsub.f32 %v779_v44, %v787_v62 }
 0x41d   : > { %v789_v0 = vmul.f32 1.442695, %v788_v63 }
 0x41f   : > { %1726 = vpow2.f32 %v789_v0 }
 0x421   : > { %v1725_v2 = vpop.eup %1724 }
 0x422   : > { %v676_v3 = vsel %vm669_vm4, %v1725_v2, 0.0  ;;  %v897_v6 = vpop.xlane.xlu1 %896 }
 0x423   : > { %677 = vadd.xlane.f32.xlu1 %v676_v3  ;;  %v898_v7 = vsub.f32 %v889_v49, %v897_v6  ;;  %v1506_v6 = vld [vmem:[%s2186_s6] ss:$0 sm:$0xff] }
 0x425   : > { %v899_v10 = vmul.f32 1.442695, %v898_v7 }
 0x427   : > { %1728 = vpow2.f32 %v899_v10 }
 0x429   : > { %v1727_v4 = vpop.eup %1726 }
 0x42a   : > { %v791_v5 = vsel %vm669_vm4, %v1727_v4, 0.0  ;;  %v1007_v8 = vpop.xlane.xlu0 %1006 }
 0x42b   : > { %792 = vadd.xlane.f32.xlu0 %v791_v5  ;;  %v1008_v11 = vsub.f32 %v999_v54, %v1007_v8 }
 0x42d   : > { %v1009_v12 = vmul.f32 1.442695, %v1008_v11 }
 0x42f   : > { %1730 = vpow2.f32 %v1009_v12 }
 0x431   : > { %v1729_v13 = vpop.eup %1728 }
 0x432   : > { %v901_v14 = vsel %vm669_vm4, %v1729_v13, 0.0 }
 0x434   : > { %797 = vrot.lane.b32.xlu1 %v2000_v26, %s1821_s20 }
 0x439   : > { %v1731_v15 = vpop.eup %1730 }
 0x43a   : > { %v1011_v16 = vsel %vm669_vm4, %v1731_v15, 0.0 }
 0x441   : > { %682 = vrot.lane.b32.xlu0 %v2000_v26, %s1822_s30  ;;  %s1420_s30 = scalar_lea.sflag [#allocation3], %s510_s1 }
 0x445   : > { %907 = vrot.lane.b32.xlu0 %v2000_v26, %s1823_s26  ;;  %s1827_s26 = smov 16  }
 0x458   : > { %902 = vadd.xlane.f32.xlu1 %v901_v14 }
 0x45c   : > { %1012 = vadd.xlane.f32.xlu1 %v1011_v16 }
 0x46d   : > { %1017 = vrot.lane.b32.xlu1 %v2000_v26, %s1824_s28  ;;  %s1828_s28 = smov 24  }
 0x4b0   : > { %v678_v17 = vpop.xlane.xlu1 %677 }
 0x4b1   : > { %1732 = vrcp.f32 %v678_v17 }
 0x4b4   : > { %v798_v27 = vpop.permute.xlu1 %797 }
 0x4b5   : > { %v803_v26 = vand.u32 %v798_v27, %v691_v23 }
 0x4b8   : > { %v793_v18 = vpop.xlane.xlu0 %792 }
 0x4b9   : > { %1734 = vrcp.f32 %v793_v18 }
 0x4bb   : > { %v1733_v21 = vpop.eup %1732 }
 0x4bc   : > { %v680_v22 = vmul.f32 %v1733_v21, %v1725_v2  ;;  %v683_v24 = vpop.permute.xlu0 %682 }
 0x4bd   : > { %v693_v25 = vand.u32 %v691_v23, %v683_v24 }
 0x4be   : > { %v681_v28 = vpack.c.bf16 %v680_v22, %v680_v22 }
 0x4bf   : > { %1577 = vmatpush3.bf16.msra.mxu0 %v693_v25  ;;  %v1510_v25 = vld [vmem:[%s2187_s7] ss:$0 sm:$0xff] }
 0x4c0   : > { %1588 = vmatprep.subr.bf16.mxu0 %v1812_v9  ;;  %v908_v31 = vpop.permute.xlu0 %907 }
 0x4c1   : > { %v913_v33 = vand.u32 %v908_v31, %v691_v23  ;;  %v1716_v31 = vld [vmem:[%s2191_s11] sm:$0xff]  }
 0x4c2   : > { %1579 = vmatmul.mubr.msk.bf16.vlgmr.msra.gmra.mrb[4].mxu0 %vm684_vm7, %v681_v28  ;;  %v1511_v28 = vld [vmem:[%s2188_s8] ss:$0 sm:$0xff] }
 0x4c3   : > { %v1735_v29 = vpop.eup %1734  ;;  %1589 = vmatpush3.bf16.msra.mxu0 %v803_v26  ;;  %1590 = vmatprep.mubr.msk.bf16.mxu0 %vm1813_vm1, %v1812_v9 }
 0x4c4   : > { %v795_v30 = vmul.f32 %v1735_v29, %v1727_v4  ;;  %1600 = vmatprep.subr.bf16.mxu0 %v1812_v9 }
 0x4c6   : > { %v796_v32 = vpack.c.bf16 %v795_v30, %v795_v30 }
 0x4ca   : > { %1591 = vmatmul.mubr.msk.bf16.vlgmr.msra.gmra.mrb[8].mxu0 %vm684_vm7, %v796_v32  ;;  %v1717_v32 = vld [vmem:[%s2191_s11 + $0x8] sm:$0xff]  }
 0x4cb   : > { %1601 = vmatpush3.bf16.msra.mxu0 %v913_v33  ;;  %1602 = vmatprep.mubr.msk.bf16.mxu0 %vm1813_vm1, %v1812_v9  ;;  %v1718_v33 = vld [vmem:[%s2191_s11 + $0x10] sm:$0xff]  }
 0x4cc   : > { %1612 = vmatprep.subr.bf16.mxu0 %v1812_v9 }
 0x4e5   : > { %v903_v34 = vpop.xlane.xlu1 %902 }
 0x4e6   : > { %1736 = vrcp.f32 %v903_v34  ;;  %v1719_v34 = vld [vmem:[%s2191_s11 + $0x18] sm:$0xff]  }
 0x4e9   : > { %v1013_v35 = vpop.xlane.xlu1 %1012 }
 0x4ea   : > { %1738 = vrcp.f32 %v1013_v35  ;;  %v1512_v35 = vld [vmem:[%s2190_s10] ss:$0 sm:$0xff] }
 0x4ed   : > { %v1018_v38 = vpop.permute.xlu1 %1017 }
 0x4ee   : > { %v1023_v41 = vand.u32 %v1018_v38, %v691_v23 }
 0x4f0   : > { %v1737_v36 = vpop.eup %1736 }
 0x4f1   : > { %v905_v37 = vmul.f32 %v1737_v36, %v1729_v13 }
 0x4f3   : > { %v906_v39 = vpack.c.bf16 %v905_v37, %v905_v37 }
 0x4f4   : > { %v1739_v40 = vpop.eup %1738 }
 0x4f5   : > { %1603 = vmatmul.mubr.msk.bf16.vlgmr.msra.gmra.mrb[12].mxu0 %vm684_vm7, %v906_v39  ;;  %v1015_v42 = vmul.f32 %v1739_v40, %v1731_v15 }
 0x4f6   : > { %1613 = vmatpush3.bf16.msra.mxu0 %v1023_v41  ;;  %1614 = vmatprep.mubr.msk.bf16.mxu0 %vm1813_vm1, %v1812_v9 }
 0x4f7   : > { %1626 = vmatprep.subr.bf16.mxu0 %v1812_v9  ;;  %v1016_v43 = vpack.c.bf16 %v1015_v42, %v1015_v42 }
 0x4fd   : > { %1615 = vmatmul.mubr.msk.bf16.vlgmr.msra.gmra.mrb[16].mxu0 %vm684_vm7, %v1016_v43 }
 0x4fe   : > { %1630 = vmatprep.mubr.msk.bf16.mxu0 %vm1813_vm1, %v1812_v9  ;;  %1627 = vmatpush3.bf16.msra.mxu0 %v1714_v20 }
 0x4ff   : > { %1628 = vmatprep.subr.bf16.mxu0 %v1812_v9 }
 0x595   : > { %v729_v44 = vpop.f32.mrb[4].mxu0 }
 0x596   : > { %v1580_v45 = vpop.f32.mrb[5].mxu0 }
 0x597   : > { %v732_v46 = vpop.f32.mrb[6].mxu0 }
 0x598   : > { %v1581_v47 = vpop.f32.mrb[7].mxu0 }
 0x59d   : > { %v839_v48 = vpop.f32.mrb[8].mxu0 }
 0x59e   : > { %1066 = vrot.lane.b32.xlu0 %v839_v48, %s1826_s29  ;;  %v1592_v49 = vpop.f32.mrb[9].mxu0  ;;  %v1517_v48 = vld [vmem:[%s2192_s12] ss:$0 sm:$0xff]  ;;  %s1526_s29 = sshll.u32 %s1936_s25, 4  ;;  %s1829_s25 = smov [#allocation2]  }
 0x59f   : > { %v842_v50 = vpop.f32.mrb[10].mxu0  ;;  %s2138_s20 = scalar_lea.hbm %s2196_s16, %s1526_s29 }
 0x5a0   : > { %v1593_v51 = vpop.f32.mrb[11].mxu0 }
 0x5c8   : > { %v949_v54 = vpop.f32.mrb[12].mxu0 }
 0x5c9   : > { %1070 = vrot.lane.b32.xlu1 %v949_v54, %s1827_s26  ;;  %v1604_v55 = vpop.f32.mrb[13].mxu0  ;;  %s1748_s26 = scalar_lea.vmem %s2140_s19, 16 }
 0x5ca   : > { %v952_v56 = vpop.f32.mrb[14].mxu0  ;;  %p1749_p11 = scmp.ne.s32.totalorder %s2140_s19, %s1748_s26 }
 0x5cb   : > { %v1605_v57 = vpop.f32.mrb[15].mxu0 }
 0x5cc   : > { %p1750_p12 = pnand %p1749_p11, %p1953_p5 }
 0x5ce   : > { %p1751_p13 = pneg %p1750_p12 }
 0x5d0   : > { %v1059_v58 = vpop.f32.mrb[16].mxu0 }
 0x5d1   : > { %1074 = vrot.lane.b32.xlu0 %v1059_v58, %s1828_s28  ;;  %v1616_v59 = vpop.f32.mrb[17].mxu0  ;;  %s1752_s28 = sshll.u32 %s1829_s25, 4  ;;  %s1753_s28 = int_to_ptr.vmem [resolvable:$false] %s1752_s28 }
 0x5d2   : > { %v1062_v60 = vpop.f32.mrb[18].mxu0  ;;  %s1754_s2 = scalar_lea.vmem %s1753_s28, 32  ;;  %p1755_p0 = scmp.lt.s32.totalorder %s2140_s19, %s1753_s28 }
 0x5d3   : > { %v1617_v61 = vpop.f32.mrb[19].mxu0  ;;  %p1756_p1 = scmp.lt.s32.totalorder %s1754_s2, %s1748_s26 }
 0x5d4   : > { %v1720_v61 = vld [vmem:[%s2195_s15] sm:$0xff]  }
 0x5d5   : > { %p1757_p2 = por %p1756_p1, %p1755_p0 }
 0x5d7   : > { %p1758_p3 = pnand %p1757_p2, %p1751_p13 }
 0x610   : > { %v1067_v62 = vpop.permute.xlu0 %1066 }
 0x611   : > { %v1077_v0 = vsel %vm622_vm3, %v729_v44, %v1067_v62  ;;  %v1721_v62 = vld [vmem:[%s2195_s15 + $0x8] sm:$0xff]  }
 0x63b   : > { %v1071_v63 = vpop.permute.xlu1 %1070 }
 0x63c   : > { %v1079_v2 = vsel %vm1078_vm8, %v1077_v0, %v1071_v63 }
 0x643   : > { %v1075_v3 = vpop.permute.xlu0 %1074 }
 0x644   : > { %v1081_v4 = vsel %vm1080_vm9, %v1079_v2, %v1075_v3 }
 0x645   : > { %v1082_v5 = vpack.c.bf16 %v1081_v4, %v1081_v4  ;;  %v1339_v4 = vld [vmem:[%s2193_s13] sm:$0x1] }
 0x647   : > { %1623 = vmatmul.mubr.msk.bf16.vlgmr.msra.gmra.mrb[16].mxu1 %vm574_vm2, %v1082_v5 }
 0x648   : > { %1642 = vmatprep.mubr.msk.bf16.mxu1 %vm1813_vm1, %v1812_v9  ;;  %1635 = vmatpush3.bf16.msra.mxu1 %v1716_v31 }
 0x649   : > { %1636 = vmatprep.subr.bf16.mxu1 %v1812_v9 }
 0x64c   : > { %1637 = vmatpush3.bf16.msra.mxu1 %v1717_v32 }
 0x64d   : > { %1638 = vmatprep.subr.bf16.mxu1 %v1812_v9 }
 0x650   : > { %1639 = vmatpush3.bf16.msra.mxu1 %v1718_v33 }
 0x651   : > { %1640 = vmatprep.subr.bf16.mxu1 %v1812_v9 }
 0x654   : > { %1641 = vmatpush3.bf16.msra.mxu1 %v1719_v34 }
 0x71a   : > { %v1143_v7 = vpop.f32.mrb[16].mxu1 }
 0x71b   : > { %v1144_v8 = vadd.f32 %v1506_v6, %v1143_v7  ;;  %v1624_v10 = vpop.f32.mrb[17].mxu1  ;;  %v1340_v6 = vld [vmem:[%s2194_s14] sm:$0x1] }
 0x71c   : > { %v1146_v11 = vpop.f32.mrb[18].mxu1 }
 0x71d   : > { %v2074_v12 = vadd.f32 %v1144_v8, %v1968_v1  ;;  %v1625_v13 = vpop.f32.mrb[19].mxu1  ;;  %v1715_v1 = vld [vmem:[%s2189_s9 + $0x8] sm:$0xff]  }
 0x71e   : > { %1629 = vmatpush3.bf16.msra.mxu0 %v1715_v1 }
 0x71f   : > { %v1152_v14 = vsel %vm521_vm0, %v2074_v12, 0.0  ;;  %1646 = vmatprep.subr.bf16.mxu0 %v1812_v9 }
 0x720   : > { %1153 = vadd.xlane.f32.xlu1 %v1152_v14 }
 0x7ad   : > { %v1154_v15 = vpop.xlane.xlu1 %1153 }
 0x7ae   : > { %v1155_v16 = vmul.f32 0.03125, %v1154_v15 }
 0x7b0   : > { %v1156_v17 = vsub.f32 %v2074_v12, %v1155_v16 }
 0x7b2   : > { %v1157_v18 = vmul.f32 %v1156_v17, %v1156_v17 }
 0x7b4   : > { %v1158_v19 = vsel %vm521_vm0, %v1157_v18, 0.0 }
 0x7b5   : > { %1159 = vadd.xlane.f32.xlu0 %v1158_v19 }
 0x842   : > { %v1160_v21 = vpop.xlane.xlu0 %1159 }
 0x843   : > { %v1161_v22 = vmul.f32 0.03125, %v1160_v21 }
 0x845   : > { %v1162_v23 = vadd.f32 1e-05, %v1161_v22 }
 0x847   : > { %1740 = vrsqrt.f32 %v1162_v23 }
 0x851   : > { %v1741_v24 = vpop.eup %1740 }
 0x852   : > { %v1164_v27 = vmul.f32 %v1741_v24, %v1156_v17 }
 0x854   : > { %v1171_v26 = vmul.f32 %v1510_v25, %v1164_v27 }
 0x856   : > { %v1178_v29 = vadd.f32 %v1511_v28, %v1171_v26 }
 0x858   : > { %v1179_v30 = vpack.c.bf16 %v1178_v29, %v1178_v29 }
 0x85a   : > { %1631 = vmatmul.mubr.msk.bf16.vlgmr.msra.gmra.mrb[20].mxu0 %vm574_vm2, %v1179_v30 }
 0x85b   : > { %1650 = vmatprep.mubr.msk.bf16.mxu0 %vm1813_vm1, %v1812_v9  ;;  %1647 = vmatpush3.bf16.msra.mxu0 %v1720_v61 }
 0x85c   : > { %1648 = vmatprep.subr.bf16.mxu0 %v1812_v9 }
 0x85f   : > { %1649 = vmatpush3.bf16.msra.mxu0 %v1721_v62 }
 0x92d   : > { %v1240_v36 = vpop.f32.mrb[20].mxu0 }
 0x92e   : > { %v1241_v37 = vadd.f32 %v1512_v35, %v1240_v36  ;;  %v1632_v38 = vpop.f32.mrb[21].mxu0 }
 0x92f   : > { %v1243_v39 = vpop.f32.mrb[22].mxu0 }
 0x930   : > { %v1516_v40 = vmul.f32 -1.702, %v1241_v37  ;;  %v1633_v41 = vpop.f32.mrb[23].mxu0 }
 0x932   : > { %v1248_v42 = vmul.f32 1.442695, %v1516_v40 }
 0x934   : > { %1742 = vpow2.f32 %v1248_v42 }
 0x93e   : > { %v1743_v43 = vpop.eup %1742 }
 0x93f   : > { %v1250_v44 = vadd.f32 1.0, %v1743_v43 }
 0x941   : > { %1744 = vrcp.f32 %v1250_v44 }
 0x94b   : > { %v1745_v45 = vpop.eup %1744 }
 0x94c   : > { %v1253_v46 = vmul.f32 %v1745_v45, %v1241_v37 }
 0x94e   : > { %v1254_v47 = vpack.c.bf16 %v1253_v46, %v1253_v46 }
 0x950   : > { %1643 = vmatmul.mubr.msk.bf16.vlgmr.msra.gmra.mrb[20].mxu1 %vm1294_vm10, %v1254_v47 }
 0xa23   : > { %v1332_v49 = vpop.f32.mrb[20].mxu1 }
 0xa24   : > { %v1333_v50 = vadd.f32 %v1517_v48, %v1332_v49  ;;  %v1644_v51 = vpop.f32.mrb[21].mxu1 }
 0xa25   : > { %v1335_v52 = vpop.f32.mrb[22].mxu1 }
 0xa26   : > { %v1645_v53 = vpop.f32.mrb[23].mxu1  ;;  %v1338_v54 = vadd.f32 %v1333_v50, %v2074_v12 }
 0xa28   : > { %v1342_v55 = vsel %vm1341_vm11, %v1338_v54, 0.0 }
 0xa29   : > { %1343 = vadd.xlane.f32.xlu0 %v1342_v55 }
 0xab6   : > { %v1344_v56 = vpop.xlane.xlu0 %1343 }
 0xab7   : > { %v1345_v57 = vmul.f32 0.03125, %v1344_v56 }
 0xab9   : > { %v1346_v58 = vsub.f32 %v1338_v54, %v1345_v57 }
 0xabb   : > { %v1347_v59 = vmul.f32 %v1346_v58, %v1346_v58 }
 0xabd   : > { %v1348_v60 = vsel %vm1341_vm11, %v1347_v59, 0.0 }
 0xabe   : > { %1349 = vadd.xlane.f32.xlu1 %v1348_v60 }
 0xb4b   : > { %v1350_v63 = vpop.xlane.xlu1 %1349 }
 0xb4c   : > { %v1351_v0 = vmul.f32 0.03125, %v1350_v63 }
 0xb4e   : > { %v1352_v2 = vadd.f32 1e-05, %v1351_v0 }
 0xb50   : > { %1746 = vrsqrt.f32 %v1352_v2 }
 0xb5a   : > { %v1747_v3 = vpop.eup %1746 }
 0xb5b   : > { %v1354_v5 = vmul.f32 %v1747_v3, %v1346_v58 }
 0xb5d   : > { %v1355_v7 = vmul.f32 %v1354_v5, %v1339_v4 }
 0xb5f   : > { %v1356_v8 = vadd.f32 %v1355_v7, %v1340_v6 }
 0xb61   : > { %v1357_v10 = vpack.c.bf16 %v1356_v8, %v1356_v8 }
 0xb63   : > { %1651 = vmatmul.mubr.msk.bf16.vlgmr.msra.gmra.mrb[24].mxu0 %vm574_vm2, %v1357_v10 }
 0xc36   : > { %v1411_v9 = vpop.f32.mrb[24].mxu0 }
 0xc37   : > { %1418 = vst.msk [vmem:[%s511_s18] sm:$0x1] %vm1417_vm12, %v1411_v9  ;;  %v1652_v11 = vpop.f32.mrb[25].mxu0 }
 0xc38   : > { %v1414_v12 = vpop.f32.mrb[26].mxu0 }
 0xc39   : > { %1761 = shalt.err (!%p1758_p3)
}
 0xc3a   : > { %s1762_s3 = scalar_lea.hbm %s2138_s20, 16  ;;  %s1766_s18 = scalar_lea.hbm %s2196_s16, 32 }
 0xc3b   : > { %p1763_p4 = scmp.ne.s32.totalorder %s2138_s20, %s1762_s3  ;;  %p1767_p9 = scmp.lt.u32.totalorder %s2138_s20, %s2196_s16 }
 0xc3c   : > { %p1768_p10 = scmp.lt.u32.totalorder %s1766_s18, %s1762_s3  ;;  %p1770_p12 = scmp.lt.u32.totalorder %s1762_s3, %s2138_s20 }
 0xc3d   : > { %p1764_p7 = pnand %p1763_p4, %p1953_p5 }
 0xc3e   : > { %p1769_p11 = por %p1768_p10, %p1767_p9 }
 0xc3f   : > { %p1765_p8 = pneg %p1764_p7 }
 0xc40   : > { %p1771_p13 = por %p1770_p12, %p1769_p11 }
 0xc42   : > { %p1772_p0 = pnand %p1771_p13, %p1765_p8 }
 0xc44   : > { %1775 = shalt.err (!%p1772_p0)
}
 0xc45   : > { %1654 = dma.vmem_to_hbm [thread:$0]  (%p1953_p5), %s2140_s19, 16, %s2138_s20, %s1420_s30   ;;  %v1653_v13 = vpop.f32.mrb[27].mxu0 }
 0xc46 PF: > { %p1660_p1 = scmp.ge.s32.totalorder %s1810_s24, 2  ;;  %s1444_s26 = sand.u32 1, %s1798_s21  }
 0xc47   : > { %s1445_s2 = scalar_lea.sflag [#allocation3], %s1444_s26 }
 0xc48   : > { %p1657_p2 = pnand %p1660_p1, %p1957_p6 }
 0xc4a   : > { %1793 = dma.done.wait (!%p1657_p2), %s1445_s2, 16  }
 0xc4b   : > { %1795 = vsyncadd (!%p1657_p2), %s1445_s2, 4294967280  ;;  %s2208_s3 = sld [smem:[#allocation5_spill]]  ;;  %p26_p3 = scmp.ge.s32.totalorder %s1940_s27, 4  }
 0xc4c   : > { %s2209_s21 = smov %s1802_s22  ;;  %s2210_s22 = smov %s1806_s23 }
 0xc4d   : > { %s2212_s24 = smov %s1940_s27  ;;  %28 = sbr.rel (!%p26_p3) target bundleno = 8 (0x8), region = 119 }
 0xc51   : > { %s2211_s23 = smov %s2208_s3 }
 0xc54   :  { %1449 = vsyncpa [#allocation3], 1 }
 0xc55   :  { %1451 = vsyncpa [#allocation3 + $0x1], 1 }

</bundles_post_ra>
